<compile_context>
chip_gen: v7x
topology: tpu7x:2x2x1
jax: 0.10.0
libtpu: 0.0.40
codegen_flags: <defaults>
</compile_context>

<pallas_src>
import functools
import math

import jax
import jax.numpy as jnp
from jax.experimental import pallas as pl
from jax.experimental.pallas import tpu as pltpu


# TODO(synk): RotaryPositionalEmbedding / apply_rotary are not defined in the
# spec; the standard GPT-NeoX "rotate-half" RoPE (base 10000) is assumed for
# both the kernel and the pure-JAX reference below.
def rope_tables(seq_len: int, dim: int, base: float = 10000.0):
    inv_freq = 1.0 / (base ** (jnp.arange(0, dim, 2, dtype=jnp.float32) / dim))
    t = jnp.arange(seq_len, dtype=jnp.float32)
    freqs = jnp.outer(t, inv_freq)                      # (S, dim/2)
    emb = jnp.concatenate([freqs, freqs], axis=-1)      # (S, dim)
    return jnp.sin(emb), jnp.cos(emb)


def _rotate_half(v):
    half = v.shape[-1] // 2
    return jnp.concatenate([-v[..., half:], v[..., :half]], axis=-1)


def _mla_head_kernel(
    x_ref,          # (1, S, D)     x[b, :, h*D:(h+1)*D] — per-head input slice
    wkrT_ref,       # (1, D, L)     w_k_rope.weight^T
    wdkvT_ref,      # (1, D, L)     w_dkv.weight^T
    wqrT_ref,       # (1, L, D)     w_q_rope.weight^T
    bqr_ref,        # (1, 1, D)     w_q_rope.bias
    absorbed_ref,   # (1, D, L)     wq.weight @ w_uk.weight^T   (absorbed_k)
    wuv_ref,        # (1, L, D)     w_uv.weight  (used untransposed, as in torch)
    woT_ref,        # (1, D, D)     w_o.weight^T
    sin_ref,        # (S, L)        shared RoPE tables (D == L)
    cos_ref,        # (S, L)
    out_ref,        # (1, S, D)     slice of the (B, S, E) output (lane-dense vst)
    ckv_ref,        # (1, 1, S, L)
    kr_ref,         # (1, 1, S, L)
    *, scale: float, past_length: int, compute_dtype,
):
    f32 = jnp.float32
    cd = compute_dtype
    x = x_ref[0].astype(cd)                                            # (S, D)
    sin = sin_ref[...]
    cos = cos_ref[...]

    # --- decoupled RoPE key path (rotate-half on VPU/XLU, not the MXU) ------
    k = jnp.dot(x, wkrT_ref[0].astype(cd), preferred_element_type=f32)  # (S, L)
    k_r = k * cos + _rotate_half(k) * sin

    # --- latent KV -----------------------------------------------------------
    c_kv = jnp.dot(x, wdkvT_ref[0].astype(cd), preferred_element_type=f32)

    # --- RoPE query (built from the latent KV, as in the reference) ----------
    q = jnp.dot(c_kv.astype(cd), wqrT_ref[0].astype(cd),
                preferred_element_type=f32) + bqr_ref[0]               # (S, D)
    q_r = q * cos + _rotate_half(q) * sin

    # --- absorbed (no-RoPE) query term ---------------------------------------
    xa = jnp.dot(x, absorbed_ref[0].astype(cd), preferred_element_type=f32)

    # --- fused score matmul: one long-K MXU op over (L + D) ------------------
    lhs = (jnp.concatenate([xa, q_r], axis=-1) * scale).astype(cd)     # (S, L+D)
    rhs = jnp.concatenate([c_kv, k_r], axis=-1).astype(cd)             # (S, L+D)
    scores = jax.lax.dot_general(lhs, rhs, (((1,), (1,)), ((), ())),
                                 preferred_element_type=f32)           # (S, S)

    # --- causal mask + unnormalized softmax ----------------------------------
    # -1e30 (not -inf): safe because the diagonal is never masked when
    # past_length >= 0; a fully-masked row would otherwise be NaN in torch.
    s_len = scores.shape[0]
    row = jax.lax.broadcasted_iota(jnp.int32, (s_len, s_len), 0)
    col = jax.lax.broadcasted_iota(jnp.int32, (s_len, s_len), 1)
    scores = jnp.where(col <= row + past_length, scores, jnp.float32(-1e30))
    m = jnp.max(scores, axis=-1, keepdims=True)
    p = jnp.exp(scores - m)                                            # (S, S)
    denom = jnp.sum(p, axis=-1, keepdims=True)                         # (S, 1)

    # --- value up-projection, PV matmul, deferred normalization, out-proj ----
    value = jnp.dot(c_kv.astype(cd), wuv_ref[0].astype(cd),
                    preferred_element_type=f32)                        # (S, D)
    attn = jnp.dot(p.astype(cd), value.astype(cd),
                   preferred_element_type=f32)                         # (S, D)
    attn = attn * (1.0 / denom)          # normalize S*D elements, not S*S
    out = jnp.dot(attn.astype(cd), woT_ref[0].astype(cd),
                  preferred_element_type=f32)                          # (S, D)

    out_ref[0] = out.astype(out_ref.dtype)
    ckv_ref[0, 0] = c_kv.astype(ckv_ref.dtype)
    kr_ref[0, 0] = k_r.astype(kr_ref.dtype)


def prepare_mla_params(params):
    """One-time weight preprocessing (hoisted out of the per-call forward path)."""
    hi = jax.lax.Precision.HIGHEST
    return {
        "wkrT": jnp.transpose(params["w_k_rope"], (0, 2, 1)),       # (H, D, L)
        "wdkvT": jnp.transpose(params["w_dkv"], (0, 2, 1)),         # (H, D, L)
        "wqrT": jnp.transpose(params["w_q_rope_w"], (0, 2, 1)),     # (H, L, D)
        "bqr": params["w_q_rope_b"][:, None, :],                    # (H, 1, D)
        "absorbed": jnp.einsum("hde,hle->hdl", params["wq"], params["w_uk"],
                               precision=hi),                       # (H, D, L)
        "wuv": params["w_uv"],                                      # (H, L, D)
        "woT": jnp.transpose(params["w_o"], (0, 2, 1)),             # (H, D, D)
    }


@functools.partial(jax.jit, static_argnames=("past_length",))
def multi_head_latent_attention(x, prepared, past_length: int = 0):
    """Fused MLA forward.  x: (B, S, E).  Returns (out, c_kv, k_r) matching
    PyTorch MultiHeadLatentAttention.forward with kv_cache=None."""
    B, S, E = x.shape
    H, D, L = prepared["wkrT"].shape
    assert E == H * D
    assert D == L, "reference module requires head_dim == kv_latent_dim"

    sin, cos = rope_tables(S, L)         # D == L: one table serves q and k
    scale = 1.0 / math.sqrt(2.0 * D)

    kernel = functools.partial(
        _mla_head_kernel, scale=scale, past_length=past_length,
        # Set jnp.bfloat16 on v6e/v7x for ~2x MXU throughput (f32 accum kept);
        # f32 here keeps the toy test bit-close to the f32 reference.
        compute_dtype=jnp.float32)

    out_shape = (
        jax.ShapeDtypeStruct((B, S, E), x.dtype),      # concat_out, written directly
        jax.ShapeDtypeStruct((B, H, S, L), x.dtype),   # c_kv
        jax.ShapeDtypeStruct((B, H, S, L), x.dtype),   # k_r
    )

    # grid = (H, B): head axis outermost so per-head weight blocks keep the
    # same block index across the inner batch sweep (no re-DMA of weights).
    def x_map(h, b):     # (B, S, E): per-(batch, head) column slice
        return (b, 0, h)

    def w_map(h, b):     # per-head weight block
        return (h, 0, 0)

    def t_map(h, b):     # broadcast RoPE tables
        return (0, 0)

    def out_map(h, b):   # (B, S, E) output column slice
        return (b, 0, h)

    def hs_map(h, b):    # (B, H, S, L) stacked outputs
        return (b, h, 0, 0)

    inputs = (x, prepared["wkrT"], prepared["wdkvT"], prepared["wqrT"],
              prepared["bqr"], prepared["absorbed"], prepared["wuv"],
              prepared["woT"], sin, cos)

    per_head_flops = 2 * S * (5 * D * L + D * D + S * (L + 2 * D))
    bytes_accessed = 4 * (sum(int(a.size) for a in inputs)
                          + B * S * E + 2 * B * H * S * L)
    cost = pl.CostEstimate(flops=int(B * H * per_head_flops),
                           transcendentals=int(B * H * S * S),
                           bytes_accessed=int(bytes_accessed))

    out, c_kv, k_r = pl.pallas_call(
        kernel,
        out_shape=out_shape,
        grid_spec=pltpu.PrefetchScalarGridSpec(
            num_scalar_prefetch=0,
            grid=(H, B),
            in_specs=[
                pl.BlockSpec((1, S, D), x_map),        # x (per-head column slice)
                pl.BlockSpec((1, D, L), w_map),        # wkrT
                pl.BlockSpec((1, D, L), w_map),        # wdkvT
                pl.BlockSpec((1, L, D), w_map),        # wqrT
                pl.BlockSpec((1, 1, D), w_map),        # bqr
                pl.BlockSpec((1, D, L), w_map),        # absorbed
                pl.BlockSpec((1, L, D), w_map),        # wuv
                pl.BlockSpec((1, D, D), w_map),        # woT
                pl.BlockSpec((S, L), t_map),           # sin
                pl.BlockSpec((S, L), t_map),           # cos
            ],
            out_specs=[
                pl.BlockSpec((1, S, D), out_map),      # lane-dense direct store
                pl.BlockSpec((1, 1, S, L), hs_map),
                pl.BlockSpec((1, 1, S, L), hs_map),
            ],
        ),
        compiler_params=pltpu.CompilerParams(
            dimension_semantics=("parallel", "parallel"),
            # 48 MiB: above the 16/32 MiB v5e/v6e defaults, below v7x's 64 MiB
            # per-TC physical VMEM.  TODO(synk): at production S, switch to a
            # flash-style S tiling instead of raising this further.
            vmem_limit_bytes=48 * 1024 * 1024,
        ),
        cost_estimate=cost,
    )(*inputs)

    return out, c_kv, k_r


# ----------------------------- pure-JAX reference ----------------------------
def _apply_rotary(v, sin, cos):
    return v * cos + _rotate_half(v) * sin


def mla_reference(x, params, past_length: int = 0):
    B, S, E = x.shape
    H, L, _ = params["w_dkv"].shape
    D = E // H
    hi = jax.lax.Precision.HIGHEST

    x_heads = jnp.transpose(x.reshape(B, S, H, D), (0, 2, 1, 3))
    sin_k, cos_k = rope_tables(S, L)
    sin_q, cos_q = rope_tables(S, D)

    outs, ckvs, krs = [], [], []
    for h in range(H):
        xi = x_heads[:, h]                                             # (B,S,D)
        absorbed = jnp.matmul(params["wq"][h], params["w_uk"][h].T, precision=hi)
        k = jnp.matmul(xi, params["w_k_rope"][h].T, precision=hi)      # (B,S,L)
        k_r = _apply_rotary(k, sin_k, cos_k)
        c_kv = jnp.matmul(xi, params["w_dkv"][h].T, precision=hi)      # (B,S,L)
        q = (jnp.matmul(c_kv, params["w_q_rope_w"][h].T, precision=hi)
             + params["w_q_rope_b"][h])
        q_r = _apply_rotary(q, sin_q, cos_q)
        s1 = jnp.matmul(jnp.matmul(xi, absorbed, precision=hi),
                        jnp.swapaxes(c_kv, -1, -2), precision=hi)
        s2 = jnp.matmul(q_r, jnp.swapaxes(k_r, -1, -2), precision=hi)
        scores = (s1 + s2) / math.sqrt(2.0 * D)
        mask = jnp.tril(jnp.ones((S, S), dtype=bool), k=past_length)
        scores = jnp.where(mask, scores, -jnp.inf)
        w = jax.nn.softmax(scores, axis=-1)
        value = jnp.matmul(c_kv, params["w_uv"][h], precision=hi)      # (B,S,D)
        out = jnp.matmul(jnp.matmul(w, value, precision=hi),
                         params["w_o"][h].T, precision=hi)
        outs.append(out); ckvs.append(c_kv); krs.append(k_r)

    return (jnp.concatenate(outs, axis=-1),
            jnp.stack(ckvs, axis=1),
            jnp.stack(krs, axis=1))


if __name__ == "__main__":
    key = jax.random.PRNGKey(0)
    B, S = 2, 8
    # The reference module requires head_dim == kv_latent_dim; 128 keeps every
    # kernel block lane-dense (unmasked vector stores).
    n_heads, embd_dim, kv_latent_dim = 2, 256, 128
    D = embd_dim // n_heads
    L = kv_latent_dim

    ks = jax.random.split(key, 9)

    def init(k, shape, fan_in):
        return jax.random.normal(k, shape, dtype=jnp.float32) / math.sqrt(fan_in)

    params = {
        "wq":         init(ks[0], (n_heads, D, D), D),
        "w_uk":       init(ks[1], (n_heads, L, D), D),
        "w_dkv":      init(ks[2], (n_heads, L, D), D),
        "w_uv":       init(ks[3], (n_heads, L, D), D),
        "w_k_rope":   init(ks[4], (n_heads, L, D), D),
        "w_q_rope_w": init(ks[5], (n_heads, D, L), L),
        "w_q_rope_b": init(ks[6], (n_heads, D), L),
        "w_o":        init(ks[7], (n_heads, D, D), D),
    }
    x = jax.random.normal(ks[8], (B, S, embd_dim), dtype=jnp.float32)

    prepared = prepare_mla_params(params)
    out, c_kv, k_r = multi_head_latent_attention(x, prepared, past_length=0)
    out, c_kv, k_r = jax.block_until_ready((out, c_kv, k_r))

    ref_out, ref_ckv, ref_kr = mla_reference(x, params, past_length=0)

    assert out.shape == (B, S, embd_dim)
    assert c_kv.shape == (B, n_heads, S, L)
    assert k_r.shape == (B, n_heads, S, L)
    assert jnp.allclose(out, ref_out, atol=2e-2, rtol=2e-2), "out mismatch"
    assert jnp.allclose(c_kv, ref_ckv, atol=2e-2, rtol=2e-2), "c_kv mismatch"
    assert jnp.allclose(k_r, ref_kr, atol=2e-2, rtol=2e-2), "k_r mismatch"

    print("KERNEL_OK")
</pallas_src>

<mosaic_0001>
module attributes {stable_mosaic.version = 11 : i64} {
  func.func @_mla_head_kernel(%arg0: i32, %arg1: i32, %arg2: memref<1x8x128xf32, #tpu.memory_space<vmem>>, %arg3: memref<1x128x128xf32, #tpu.memory_space<vmem>>, %arg4: memref<1x128x128xf32, #tpu.memory_space<vmem>>, %arg5: memref<1x128x128xf32, #tpu.memory_space<vmem>>, %arg6: memref<1x1x128xf32, #tpu.memory_space<vmem>>, %arg7: memref<1x128x128xf32, #tpu.memory_space<vmem>>, %arg8: memref<1x128x128xf32, #tpu.memory_space<vmem>>, %arg9: memref<1x128x128xf32, #tpu.memory_space<vmem>>, %arg10: memref<8x128xf32, #tpu.memory_space<vmem>>, %arg11: memref<8x128xf32, #tpu.memory_space<vmem>>, %arg12: memref<1x8x128xf32, #tpu.memory_space<vmem>>, %arg13: memref<1x1x8x128xf32, #tpu.memory_space<vmem>>, %arg14: memref<1x1x8x128xf32, #tpu.memory_space<vmem>>) attributes {dimension_semantics = [#tpu.dimension_semantics<parallel>, #tpu.dimension_semantics<parallel>], iteration_bounds = array<i64: 2, 2>, scalar_prefetch = 0 : i64, scratch_operands = 0 : i64, tpu.core_type = #tpu.core_type<tc>, window_params = [{transform_indices = @transform_0, window_bounds = array<i64: 1, 8, 128>}, {transform_indices = @transform_1, window_bounds = array<i64: 1, 128, 128>}, {transform_indices = @transform_2, window_bounds = array<i64: 1, 128, 128>}, {transform_indices = @transform_3, window_bounds = array<i64: 1, 128, 128>}, {transform_indices = @transform_4, window_bounds = array<i64: 1, 1, 128>}, {transform_indices = @transform_5, window_bounds = array<i64: 1, 128, 128>}, {transform_indices = @transform_6, window_bounds = array<i64: 1, 128, 128>}, {transform_indices = @transform_7, window_bounds = array<i64: 1, 128, 128>}, {pipeline_mode = #tpu.pipeline_mode<synchronous>, transform_indices = @transform_8, window_bounds = array<i64: 8, 128>}, {pipeline_mode = #tpu.pipeline_mode<synchronous>, transform_indices = @transform_9, window_bounds = array<i64: 8, 128>}, {transform_indices = @transform_10, window_bounds = array<i64: 1, 8, 128>}, {transform_indices = @transform_11, window_bounds = array<i64: 1, 1, 8, 128>}, {transform_indices = @transform_12, window_bounds = array<i64: 1, 1, 8, 128>}]} {
    %c0 = arith.constant 0 : index
    %c0_0 = arith.constant 0 : index
    %c0_1 = arith.constant 0 : index
    %0 = vector.load %arg2[%c0, %c0_0, %c0_1] : memref<1x8x128xf32, #tpu.memory_space<vmem>>, vector<1x8x128xf32>
    %1 = vector.shape_cast %0 : vector<1x8x128xf32> to vector<8x128xf32>
    %c0_2 = arith.constant 0 : index
    %c0_3 = arith.constant 0 : index
    %2 = vector.load %arg10[%c0_2, %c0_3] : memref<8x128xf32, #tpu.memory_space<vmem>>, vector<8x128xf32>
    %c0_4 = arith.constant 0 : index
    %c0_5 = arith.constant 0 : index
    %3 = vector.load %arg11[%c0_4, %c0_5] : memref<8x128xf32, #tpu.memory_space<vmem>>, vector<8x128xf32>
    %c0_6 = arith.constant 0 : index
    %c0_7 = arith.constant 0 : index
    %c0_8 = arith.constant 0 : index
    %4 = vector.load %arg3[%c0_6, %c0_7, %c0_8] : memref<1x128x128xf32, #tpu.memory_space<vmem>>, vector<1x128x128xf32>
    %5 = vector.shape_cast %4 : vector<1x128x128xf32> to vector<128x128xf32>
    %cst = arith.constant dense<0.000000e+00> : vector<8x128xf32>
    %6 = tpu.matmul %1, %5, %cst {dimension_numbers = #tpu.dot_dimension_numbers<[1], [0], [0], [1], [0, 0, 1, 1], [], []>} : vector<8x128xf32>, vector<128x128xf32>, vector<8x128xf32> -> vector<8x128xf32>
    %7 = arith.mulf %6, %3 : vector<8x128xf32>
    %8 = vector.extract_strided_slice %6 {offsets = [0, 64], sizes = [8, 64], strides = [1, 1]} : vector<8x128xf32> to vector<8x64xf32>
    %cst_9 = arith.constant 0.000000e+00 : f32
    %9 = vector.broadcast %cst_9 : f32 to vector<8x64xf32>
    %10 = arith.subf %9, %8 : vector<8x64xf32>
    %11 = vector.extract_strided_slice %6 {offsets = [0, 0], sizes = [8, 64], strides = [1, 1]} : vector<8x128xf32> to vector<8x64xf32>
    %12 = tpu.concatenate %10, %11 in 1 : vector<8x64xf32>, vector<8x64xf32> -> vector<8x128xf32>
    %13 = arith.mulf %12, %2 : vector<8x128xf32>
    %14 = arith.addf %7, %13 : vector<8x128xf32>
    %c0_10 = arith.constant 0 : index
    %c0_11 = arith.constant 0 : index
    %c0_12 = arith.constant 0 : index
    %15 = vector.load %arg4[%c0_10, %c0_11, %c0_12] : memref<1x128x128xf32, #tpu.memory_space<vmem>>, vector<1x128x128xf32>
    %16 = vector.shape_cast %15 : vector<1x128x128xf32> to vector<128x128xf32>
    %cst_13 = arith.constant dense<0.000000e+00> : vector<8x128xf32>
    %17 = tpu.matmul %1, %16, %cst_13 {dimension_numbers = #tpu.dot_dimension_numbers<[1], [0], [0], [1], [0, 0, 1, 1], [], []>} : vector<8x128xf32>, vector<128x128xf32>, vector<8x128xf32> -> vector<8x128xf32>
    %c0_14 = arith.constant 0 : index
    %c0_15 = arith.constant 0 : index
    %c0_16 = arith.constant 0 : index
    %18 = vector.load %arg5[%c0_14, %c0_15, %c0_16] : memref<1x128x128xf32, #tpu.memory_space<vmem>>, vector<1x128x128xf32>
    %19 = vector.shape_cast %18 : vector<1x128x128xf32> to vector<128x128xf32>
    %cst_17 = arith.constant dense<0.000000e+00> : vector<8x128xf32>
    %20 = tpu.matmul %17, %19, %cst_17 {dimension_numbers = #tpu.dot_dimension_numbers<[1], [0], [0], [1], [0, 0, 1, 1], [], []>} : vector<8x128xf32>, vector<128x128xf32>, vector<8x128xf32> -> vector<8x128xf32>
    %c0_18 = arith.constant 0 : index
    %c0_19 = arith.constant 0 : index
    %c0_20 = arith.constant 0 : index
    %21 = vector.load %arg6[%c0_18, %c0_19, %c0_20] : memref<1x1x128xf32, #tpu.memory_space<vmem>>, vector<1x1x128xf32>
    %22 = vector.shape_cast %21 : vector<1x1x128xf32> to vector<1x128xf32>
    %23 = vector.broadcast %22 : vector<1x128xf32> to vector<8x128xf32>
    %24 = arith.addf %20, %23 : vector<8x128xf32>
    %25 = arith.mulf %24, %3 : vector<8x128xf32>
    %26 = vector.extract_strided_slice %24 {offsets = [0, 64], sizes = [8, 64], strides = [1, 1]} : vector<8x128xf32> to vector<8x64xf32>
    %cst_21 = arith.constant 0.000000e+00 : f32
    %27 = vector.broadcast %cst_21 : f32 to vector<8x64xf32>
    %28 = arith.subf %27, %26 : vector<8x64xf32>
    %29 = vector.extract_strided_slice %24 {offsets = [0, 0], sizes = [8, 64], strides = [1, 1]} : vector<8x128xf32> to vector<8x64xf32>
    %30 = tpu.concatenate %28, %29 in 1 : vector<8x64xf32>, vector<8x64xf32> -> vector<8x128xf32>
    %31 = arith.mulf %30, %2 : vector<8x128xf32>
    %32 = arith.addf %25, %31 : vector<8x128xf32>
    %c0_22 = arith.constant 0 : index
    %c0_23 = arith.constant 0 : index
    %c0_24 = arith.constant 0 : index
    %33 = vector.load %arg7[%c0_22, %c0_23, %c0_24] : memref<1x128x128xf32, #tpu.memory_space<vmem>>, vector<1x128x128xf32>
    %34 = vector.shape_cast %33 : vector<1x128x128xf32> to vector<128x128xf32>
    %cst_25 = arith.constant dense<0.000000e+00> : vector<8x128xf32>
    %35 = tpu.matmul %1, %34, %cst_25 {dimension_numbers = #tpu.dot_dimension_numbers<[1], [0], [0], [1], [0, 0, 1, 1], [], []>} : vector<8x128xf32>, vector<128x128xf32>, vector<8x128xf32> -> vector<8x128xf32>
    %36 = tpu.concatenate %35, %32 in 1 : vector<8x128xf32>, vector<8x128xf32> -> vector<8x256xf32>
    %cst_26 = arith.constant 6.250000e-02 : f32
    %37 = vector.broadcast %cst_26 : f32 to vector<8x256xf32>
    %38 = arith.mulf %36, %37 : vector<8x256xf32>
    %39 = tpu.concatenate %17, %14 in 1 : vector<8x128xf32>, vector<8x128xf32> -> vector<8x256xf32>
    %cst_27 = arith.constant dense<0.000000e+00> : vector<8x8xf32>
    %40 = tpu.matmul %38, %39, %cst_27 {dimension_numbers = #tpu.dot_dimension_numbers<[1], [1], [0], [0], [0, 0, 1, 0], [], []>} : vector<8x256xf32>, vector<8x256xf32>, vector<8x8xf32> -> vector<8x8xf32>
    %41 = tpu.iota {dimensions = array<i32: 0>} : vector<8x8xi32>
    %42 = tpu.iota {dimensions = array<i32: 1>} : vector<8x8xi32>
    %c0_i32 = arith.constant 0 : i32
    %43 = vector.broadcast %c0_i32 : i32 to vector<8x8xi32>
    %44 = arith.addi %41, %43 : vector<8x8xi32>
    %45 = arith.cmpi sle, %42, %44 : vector<8x8xi32>
    %cst_28 = arith.constant -1.000000e+30 : f32
    %46 = vector.broadcast %cst_28 : f32 to vector<8x8xf32>
    %47 = arith.select %45, %40, %46 : vector<8x8xi1>, vector<8x8xf32>
    %cst_29 = arith.constant dense<0xFF800000> : vector<8xf32>
    %48 = vector.multi_reduction <maximumf>, %47, %cst_29 [1] : vector<8x8xf32> to vector<8xf32>
    %49 = vector.shape_cast %48 : vector<8xf32> to vector<8x1xf32>
    %50 = vector.broadcast %49 : vector<8x1xf32> to vector<8x8xf32>
    %51 = arith.subf %47, %50 : vector<8x8xf32>
    %52 = math.exp %51 : vector<8x8xf32>
    %cst_30 = arith.constant dense<0.000000e+00> : vector<8xf32>
    %53 = vector.multi_reduction <add>, %52, %cst_30 [1] : vector<8x8xf32> to vector<8xf32>
    %54 = vector.shape_cast %53 : vector<8xf32> to vector<8x1xf32>
    %c0_31 = arith.constant 0 : index
    %c0_32 = arith.constant 0 : index
    %c0_33 = arith.constant 0 : index
    %55 = vector.load %arg8[%c0_31, %c0_32, %c0_33] : memref<1x128x128xf32, #tpu.memory_space<vmem>>, vector<1x128x128xf32>
    %56 = vector.shape_cast %55 : vector<1x128x128xf32> to vector<128x128xf32>
    %cst_34 = arith.constant dense<0.000000e+00> : vector<8x128xf32>
    %57 = tpu.matmul %17, %56, %cst_34 {dimension_numbers = #tpu.dot_dimension_numbers<[1], [0], [0], [1], [0, 0, 1, 1], [], []>} : vector<8x128xf32>, vector<128x128xf32>, vector<8x128xf32> -> vector<8x128xf32>
    %cst_35 = arith.constant dense<0.000000e+00> : vector<8x128xf32>
    %58 = tpu.matmul %52, %57, %cst_35 {dimension_numbers = #tpu.dot_dimension_numbers<[1], [0], [0], [1], [0, 0, 1, 1], [], []>} : vector<8x8xf32>, vector<8x128xf32>, vector<8x128xf32> -> vector<8x128xf32>
    %cst_36 = arith.constant 1.000000e+00 : f32
    %59 = vector.broadcast %cst_36 : f32 to vector<8x1xf32>
    %60 = arith.divf %59, %54 : vector<8x1xf32>
    %61 = vector.broadcast %60 : vector<8x1xf32> to vector<8x128xf32>
    %62 = arith.mulf %58, %61 : vector<8x128xf32>
    %c0_37 = arith.constant 0 : index
    %c0_38 = arith.constant 0 : index
    %c0_39 = arith.constant 0 : index
    %63 = vector.load %arg9[%c0_37, %c0_38, %c0_39] : memref<1x128x128xf32, #tpu.memory_space<vmem>>, vector<1x128x128xf32>
    %64 = vector.shape_cast %63 : vector<1x128x128xf32> to vector<128x128xf32>
    %cst_40 = arith.constant dense<0.000000e+00> : vector<8x128xf32>
    %65 = tpu.matmul %62, %64, %cst_40 {dimension_numbers = #tpu.dot_dimension_numbers<[1], [0], [0], [1], [0, 0, 1, 1], [], []>} : vector<8x128xf32>, vector<128x128xf32>, vector<8x128xf32> -> vector<8x128xf32>
    %c0_41 = arith.constant 0 : index
    %c0_42 = arith.constant 0 : index
    %c0_43 = arith.constant 0 : index
    %66 = vector.load %arg12[%c0_41, %c0_42, %c0_43] : memref<1x8x128xf32, #tpu.memory_space<vmem>>, vector<1x8x128xf32>
    %67 = vector.shape_cast %66 : vector<1x8x128xf32> to vector<8x128xf32>
    %68 = vector.shape_cast %65 : vector<8x128xf32> to vector<1x8x128xf32>
    tpu.vector_store %arg12[%c0_41, %c0_42, %c0_43], %68 {strides = array<i32>} : memref<1x8x128xf32, #tpu.memory_space<vmem>>, vector<1x8x128xf32>,
    %c0_44 = arith.constant 0 : index
    %c0_45 = arith.constant 0 : index
    %c0_46 = arith.constant 0 : index
    %c0_47 = arith.constant 0 : index
    %69 = vector.load %arg13[%c0_44, %c0_45, %c0_46, %c0_47] : memref<1x1x8x128xf32, #tpu.memory_space<vmem>>, vector<1x1x8x128xf32>
    %70 = vector.shape_cast %69 : vector<1x1x8x128xf32> to vector<8x128xf32>
    %71 = vector.shape_cast %17 : vector<8x128xf32> to vector<1x1x8x128xf32>
    tpu.vector_store %arg13[%c0_44, %c0_45, %c0_46, %c0_47], %71 {strides = array<i32>} : memref<1x1x8x128xf32, #tpu.memory_space<vmem>>, vector<1x1x8x128xf32>,
    %c0_48 = arith.constant 0 : index
    %c0_49 = arith.constant 0 : index
    %c0_50 = arith.constant 0 : index
    %c0_51 = arith.constant 0 : index
    %72 = vector.load %arg14[%c0_48, %c0_49, %c0_50, %c0_51] : memref<1x1x8x128xf32, #tpu.memory_space<vmem>>, vector<1x1x8x128xf32>
    %73 = vector.shape_cast %72 : vector<1x1x8x128xf32> to vector<8x128xf32>
    %74 = vector.shape_cast %14 : vector<8x128xf32> to vector<1x1x8x128xf32>
    tpu.vector_store %arg14[%c0_48, %c0_49, %c0_50, %c0_51], %74 {strides = array<i32>} : memref<1x1x8x128xf32, #tpu.memory_space<vmem>>, vector<1x1x8x128xf32>,
    return
  }
  func.func @transform_0(%arg0: i32, %arg1: i32) -> (i32, i32, i32) {
    %c0_i32 = arith.constant 0 : i32
    %c0_i32_0 = arith.constant 0 : i32
    return %arg1, %c0_i32, %arg0 : i32, i32, i32
  }
  func.func @transform_1(%arg0: i32, %arg1: i32) -> (i32, i32, i32) {
    %c0_i32 = arith.constant 0 : i32
    %c0_i32_0 = arith.constant 0 : i32
    %c0_i32_1 = arith.constant 0 : i32
    return %arg0, %c0_i32, %c0_i32_0 : i32, i32, i32
  }
  func.func @transform_2(%arg0: i32, %arg1: i32) -> (i32, i32, i32) {
    %c0_i32 = arith.constant 0 : i32
    %c0_i32_0 = arith.constant 0 : i32
    %c0_i32_1 = arith.constant 0 : i32
    return %arg0, %c0_i32, %c0_i32_0 : i32, i32, i32
  }
  func.func @transform_3(%arg0: i32, %arg1: i32) -> (i32, i32, i32) {
    %c0_i32 = arith.constant 0 : i32
    %c0_i32_0 = arith.constant 0 : i32
    %c0_i32_1 = arith.constant 0 : i32
    return %arg0, %c0_i32, %c0_i32_0 : i32, i32, i32
  }
  func.func @transform_4(%arg0: i32, %arg1: i32) -> (i32, i32, i32) {
    %c0_i32 = arith.constant 0 : i32
    %c0_i32_0 = arith.constant 0 : i32
    %c0_i32_1 = arith.constant 0 : i32
    return %arg0, %c0_i32, %c0_i32_0 : i32, i32, i32
  }
  func.func @transform_5(%arg0: i32, %arg1: i32) -> (i32, i32, i32) {
    %c0_i32 = arith.constant 0 : i32
    %c0_i32_0 = arith.constant 0 : i32
    %c0_i32_1 = arith.constant 0 : i32
    return %arg0, %c0_i32, %c0_i32_0 : i32, i32, i32
  }
  func.func @transform_6(%arg0: i32, %arg1: i32) -> (i32, i32, i32) {
    %c0_i32 = arith.constant 0 : i32
    %c0_i32_0 = arith.constant 0 : i32
    %c0_i32_1 = arith.constant 0 : i32
    return %arg0, %c0_i32, %c0_i32_0 : i32, i32, i32
  }
  func.func @transform_7(%arg0: i32, %arg1: i32) -> (i32, i32, i32) {
    %c0_i32 = arith.constant 0 : i32
    %c0_i32_0 = arith.constant 0 : i32
    %c0_i32_1 = arith.constant 0 : i32
    return %arg0, %c0_i32, %c0_i32_0 : i32, i32, i32
  }
  func.func @transform_8(%arg0: i32, %arg1: i32) -> (i32, i32) {
    %c0_i32 = arith.constant 0 : i32
    %c0_i32_0 = arith.constant 0 : i32
    %c0_i32_1 = arith.constant 0 : i32
    return %c0_i32, %c0_i32_0 : i32, i32
  }
  func.func @transform_9(%arg0: i32, %arg1: i32) -> (i32, i32) {
    %c0_i32 = arith.constant 0 : i32
    %c0_i32_0 = arith.constant 0 : i32
    %c0_i32_1 = arith.constant 0 : i32
    return %c0_i32, %c0_i32_0 : i32, i32
  }
  func.func @transform_10(%arg0: i32, %arg1: i32) -> (i32, i32, i32) {
    %c0_i32 = arith.constant 0 : i32
    %c0_i32_0 = arith.constant 0 : i32
    return %arg1, %c0_i32, %arg0 : i32, i32, i32
  }
  func.func @transform_11(%arg0: i32, %arg1: i32) -> (i32, i32, i32, i32) {
    %c0_i32 = arith.constant 0 : i32
    %c0_i32_0 = arith.constant 0 : i32
    %c0_i32_1 = arith.constant 0 : i32
    return %arg1, %arg0, %c0_i32, %c0_i32_0 : i32, i32, i32, i32
  }
  func.func @transform_12(%arg0: i32, %arg1: i32) -> (i32, i32, i32, i32) {
    %c0_i32 = arith.constant 0 : i32
    %c0_i32_0 = arith.constant 0 : i32
    %c0_i32_1 = arith.constant 0 : i32
    return %arg1, %arg0, %c0_i32, %c0_i32_0 : i32, i32, i32, i32
  }
}

</mosaic_0001>

<bundles_post_ra>
// kernel: multi_head_latent_attention.1
= control target key start
LH: loop header
LB: loop body
LE: loop exit
PB: predicated region body
PF: predicated region fallthrough
CT: control target
= control target key end

     0   :  { %s3611_s0 = inlined_call_operand.vmem [shape: f32[2,8,256], index: 0, kind: input, shape index: {}]   ;;  %s3612_s1 = inlined_call_operand.hbm [shape: f32[2,128,128], index: 1, kind: input, shape index: {}]   ;;  %s3613_s2 = inlined_call_operand.hbm [shape: f32[2,128,128], index: 2, kind: input, shape index: {}]   ;;  %s3614_s3 = inlined_call_operand.hbm [shape: f32[2,128,128], index: 3, kind: input, shape index: {}]   ;;  %s3615_s4 = inlined_call_operand.vmem [shape: f32[2,1,128], index: 4, kind: input, shape index: {}]   ;;  %s3616_s5 = inlined_call_operand.hbm [shape: f32[2,128,128], index: 5, kind: input, shape index: {}]   ;;  %s3617_s6 = inlined_call_operand.hbm [shape: f32[2,128,128], index: 6, kind: input, shape index: {}]   ;;  %s3618_s7 = inlined_call_operand.hbm [shape: f32[2,128,128], index: 7, kind: input, shape index: {}]   ;;  %s3619_s8 = inlined_call_operand.vmem [shape: f32[8,128], index: 8, kind: input, shape index: {}]   ;;  %s3620_s9 = inlined_call_operand.vmem [shape: f32[8,128], index: 9, kind: input, shape index: {}]   ;;  %s3621_s10 = inlined_call_operand.hbm [shape: f32[2,8,256], index: 10, kind: output, shape index: {0}]   ;;  %s3622_s11 = inlined_call_operand.hbm [shape: f32[2,2,8,128], index: 11, kind: output, shape index: {1}]   ;;  %s3623_s12 = inlined_call_operand.hbm [shape: f32[2,2,8,128], index: 12, kind: output, shape index: {2}]  }
   0x1   :  { %3646 = sst [smem:[#allocation35_spill]] %s3613_s2 }
   0x2   :  { %3647 = sst [smem:[#allocation36_spill]] %s3615_s4 }
   0x3   :  { %3648 = sst [smem:[#allocation37_spill]] %s3616_s5 }
   0x4   :  { %3649 = sst [smem:[#allocation38_spill]] %s3619_s8 }
   0x5   :  { %3650 = sst [smem:[#allocation39_spill]] %s3620_s9 }
   0x6   :  { %3651 = sst [smem:[#allocation40_spill]] %s3621_s10 }
   0x7   :  { %3652 = sst [smem:[#allocation41_spill]] %s3622_s11 }
   0x8   :  { %3653 = sst [smem:[#allocation42_spill]] %s3623_s12 }
   0x9   :  { %18 = vsyncpa [#allocation3], 0 }
   0xa   :  { %20 = vsyncpa [#allocation3 + $0x1], 0 }
   0xb   :  { %21 = vsyncpa [#allocation6], 0 }
   0xc   :  { %23 = vsyncpa [#allocation6 + $0x1], 0 }
   0xd   :  { %24 = vsyncpa [#allocation9], 0 }
   0xe   :  { %26 = vsyncpa [#allocation9 + $0x1], 0 }
   0xf   :  { %27 = vsyncpa [#allocation12], 0 }
  0x10   :  { %29 = vsyncpa [#allocation12 + $0x1], 0 }
  0x11   :  { %30 = vsyncpa [#allocation4], 0 }
  0x12   :  { %32 = vsyncpa [#allocation4 + $0x1], 0 }
  0x13   :  { %33 = vsyncpa [#allocation15], 0 }
  0x14   :  { %35 = vsyncpa [#allocation15 + $0x1], 0  ;;  %s2886_s21 = smov 0   ;;  %s2888_s22 = smov 0  }
  0x15   :  { %s2890_s23 = smov 0   ;;  %s2892_s24 = smov 0  }
  0x16   :  { %s2894_s25 = smov 0   ;;  %s2896_s26 = smov 0  }
  0x17   :  { %s2898_s27 = smov 0   ;;  %s2900_s28 = smov 0  }
  0x18   :  { %s2902_s29 = smov 0   ;;  %s2904_s30 = smov 0  }
  0x19   :  { %s2906_s13 = smov 0  }
  0x1a LB: > { %3654 = sst [smem:[#allocation23_spill]] %s2764_s21  ;;  %s2940_s14 = sadd.s32 4294967295, %s2804_s13   ;;  %s2804_s13 = sphi %s2906_s13, %s41_s13   ;;  %s2800_s30 = sphi %s2904_s30, %s3706_s30   ;;  %s2796_s29 = sphi %s2902_s29, %s3705_s29   ;;  %s2792_s28 = sphi %s2900_s28, %s3704_s28   ;;  %s2788_s27 = sphi %s2898_s27, %s3703_s27   ;;  %s2784_s26 = sphi %s2896_s26, %s3702_s26   ;;  %s2780_s25 = sphi %s2894_s25, %s3710_s25   ;;  %s2776_s24 = sphi %s2892_s24, %s3709_s24   ;;  %s2772_s23 = sphi %s2890_s23, %s3700_s23   ;;  %s2768_s22 = sphi %s2888_s22, %s3708_s22   ;;  %s2764_s21 = sphi %s2886_s21, %s3707_s21  }
  0x1b   : > { %3655 = sst [smem:[#allocation24_spill]] %s2772_s23  ;;  %s50_s16 = sadd.s32 1, %s2796_s29 }
  0x1c   : > { %3656 = sst [smem:[#allocation25_spill]] %s2784_s26  ;;  %s53_s17 = sadd.s32 1, %s2800_s30 }
  0x1d   : > { %3657 = sst [smem:[#allocation26_spill]] %s2796_s29  ;;  %p51_p0 = scmp.ge.s32.totalorder %s50_s16, 2 }
  0x1e   : > { %3658 = sst [smem:[#allocation27_spill]] %s2800_s30  ;;  %s88_s18 = sadd.s32 1, %s2784_s26 }
  0x1f   : > { %3659 = sst [smem:[#allocation28_spill]] %s2804_s13  ;;  %p95_p1 = scmp.ne.s32.totalorder %s2784_s26, %s2780_s25 }
  0x20   : > { %p96_p2 = scmp.eq.s32.totalorder %s2804_s13, 0  ;;  %s3712_s16 = smov (%p51_p0, %s50_s16), 0 }
  0x21   : > { %3660 = sst [smem:[#allocation29_spill]] %s3712_s16  ;;  %s3714_s17 = smov (!%p51_p0, %s53_s17), %s2800_s30 }
  0x22   : > { %p2952_p3 = por %p96_p2, %p95_p1  ;;  %p101_p4 = scmp.ne.s32.totalorder %s2780_s25, %s2776_s24 }
  0x23   : > { %p55_p5 = scmp.ge.s32.totalorder %s3714_s17, 2  ;;  %p102_p6 = scmp.eq.s32.totalorder %s2940_s14, 0 }
  0x24   : > { %s309_s20 = ssub.s32 %s2796_s29, %s3712_s16  ;;  %s314_s15 = sadd.s32 1, %s2772_s23 }
  0x25   : > { %s3716_s17 = smov (%p55_p5, %s3714_s17), 0  ;;  %p2963_p7 = por %p102_p6, %p101_p4 }
  0x26   : > { %3662 = sst [smem:[#allocation30_spill]] %s3716_s17  ;;  %p324_p8 = scmp.ne.s32.totalorder %s2772_s23, %s2768_s22 }
  0x27   : > { %s3663_s10 = scalar_select %p2963_p7, 1, 0 }
  0x28   : > { %s85_s24 = ssub.s32 %s2800_s30, %s3716_s17  ;;  %p325_p9 = scmp.eq.s32.totalorder %s2940_s14, 3 }
  0x29   : > { %p86_p10 = scmp.eq.s32.totalorder %s85_s24, 0  ;;  %s311_s12 = sor.u32 %s309_s20, %s85_s24 }
  0x2a   : > { %p312_p11 = scmp.eq.s32.totalorder %s311_s12, 0  ;;  %p2972_p12 = por %p325_p9, %p324_p8 }
  0x2b   : > { %s2977_s29 = scalar_select %p86_p10, %s2784_s26, %s88_s18  }
  0x2c   : > { %s3664_s16 = scalar_select %p2972_p12, 1, 0 }
  0x2d   : > { %3666 = sst [smem:[#allocation32_spill]] %s2977_s29  ;;  %p330_p13 = scmp.ne.s32.totalorder %s2768_s22, %s2764_s21 }
  0x2e   : > { %3665 = sst [smem:[#allocation31_spill]] %s3664_s16  ;;  %s3668_s4 = sadd.s32 4294967294, %s2804_s13  }
  0x2f   : > { %s2980_s11 = scalar_select %p312_p11, %s2772_s23, %s314_s15  }
  0x30   : > { %p331_p0 = scmp.eq.s32.totalorder %s3668_s4, 3  ;;  %p2330_p1 = scmp.lt.s32.totalorder %s2804_s13, 4 }
  0x31   : > { %3667 = sst [smem:[#allocation33_spill]] %s2980_s11  ;;  %s2992_s12 = sand.u32 1, %s2784_s26  }
  0x32   : > { %p2987_p2 = por %p331_p0, %p330_p13  ;;  %s2995_s20 = sshll.u32 %s2992_s12, 7 }
  0x33   : > { %s2998_s18 = sshll.u32 %s2800_s30, 11  ;;  %p3002_p4 = pnand %p2330_p1, %p2952_p3 }
  0x34   : > { %s3669_s17 = scalar_select %p2987_p2, 1, 0 }
  0x35   : > { %s3637_s4 = sand.u32 1, %s2804_s13   ;;  %s3672_s2 = sld [smem:[#allocation35_spill]] }
  0x36   : > { %3670 = sst [smem:[#allocation34_spill]] %s3669_s17  ;;  %s449_s26 = scalar_lea.vmem [#allocation5], %s2995_s20 }
  0x37   : > { %s456_s30 = sshll.u32 %s449_s26, 4  ;;  %s3020_s19 = scalar_lea.sflag [#allocation6], %s3637_s4  ;;  %s3015_s30 = int_to_ptr.vmem [resolvable:$true] %s456_s30 }
  0x38   : > { %p3026_p8 = pneg %p3002_p4 }
  0x3b   : > { %s3011_s11 = scalar_lea.hbm %s3672_s2, %s2998_s18  ;;  %s2435_s17 = scalar_lea.hbm %s3672_s2, 4096 }
  0x3c   : > { %s2430_s23 = scalar_lea.hbm %s3011_s11, 2048  ;;  %p2436_p11 = scmp.lt.u32.totalorder %s3011_s11, %s3672_s2 }
  0x3d   : > { %p2431_p6 = scmp.ne.s32.totalorder %s3011_s11, %s2430_s23  ;;  %p2437_p13 = scmp.lt.u32.totalorder %s2435_s17, %s2430_s23 }
  0x3e   : > { %p2439_p1 = scmp.lt.u32.totalorder %s2430_s23, %s3011_s11 }
  0x3f   : > { %p2433_p9 = pnand %p3026_p8, %p2431_p6  ;;  %p2438_p0 = por %p2437_p13, %p2436_p11 }
  0x41   : > { %p2434_p10 = pneg %p2433_p9  ;;  %p2440_p5 = por %p2439_p1, %p2438_p0 }
  0x43   : > { %p2441_p3 = pnand %p2440_p5, %p2434_p10 }
  0x45   : > { %2444 = shalt.err (!%p2441_p3)
}
  0x46   : > { %s2445_s4 = scalar_lea.vmem %s3015_s30, 2048  ;;  %s2806_s24 = smov [#allocation5]  }
  0x47   : > { %p2446_p6 = scmp.ne.s32.totalorder %s3015_s30, %s2445_s4  ;;  %s2450_s26 = sshll.u32 %s2806_s24, 4  ;;  %s2451_s26 = int_to_ptr.vmem [resolvable:$false] %s2450_s26 }
  0x48   : > { %s2452_s21 = scalar_lea.vmem %s2451_s26, 4096  ;;  %p2453_p12 = scmp.lt.s32.totalorder %s3015_s30, %s2451_s26 }
  0x49   : > { %p2448_p9 = pnand %p2446_p6, %p3026_p8  ;;  %p2454_p7 = scmp.lt.s32.totalorder %s2452_s21, %s2445_s4 }
  0x4b   : > { %p2449_p2 = pneg %p2448_p9  ;;  %p2455_p11 = por %p2454_p7, %p2453_p12 }
  0x4d   : > { %p2456_p13 = pnand %p2455_p11, %p2449_p2 }
  0x4f   : > { %2459 = shalt.err (!%p2456_p13)
}
  0x50   : > { %s3640_s23 = smov 128   ;;  %s3642_s16 = smov 8  }
  0x51   : > { %2307 = dma.hbm_to_vmem [thread:$0]  (!%p3002_p4), %s3011_s11, 2048, %s3015_s30, %s3020_s19, %s3640_s23, %s3640_s23, %s3642_s16  }
  0x52   : > { %p3674_p7 = scmp.lt.s32.totalorder %s2804_s13, 5  ;;  %p3675_p12 = scmp.ge.s32.totalorder %s2804_s13, 1 }
  0x53   : > { %s3677_s5 = sld [smem:[#allocation37_spill]]  ;;  %s497_s21 = scalar_lea.vmem [#allocation8], %s2995_s20 }
  0x54   : > { %p3057_p2 = pnand %p3675_p12, %p3674_p7  ;;  %s504_s2 = sshll.u32 %s497_s21, 4  ;;  %s3068_s2 = int_to_ptr.vmem [resolvable:$true] %s504_s2 }
  0x55   : > { %s3678_s11 = sand.u32 1, %s2804_s13  }
  0x56   : > { %s3676_s17 = scalar_select %p3057_p2, 1, 0 }
  0x57   : > { %s3072_s30 = scalar_lea.sflag [#allocation9], %s3678_s11 }
  0x59   : > { %s3065_s26 = scalar_lea.hbm %s3677_s5, %s2998_s18  ;;  %s2465_s24 = scalar_lea.hbm %s3677_s5, 4096 }
  0x5a   : > { %s2460_s23 = scalar_lea.hbm %s3065_s26, 2048  ;;  %p2466_p0 = scmp.lt.u32.totalorder %s3065_s26, %s3677_s5 }
  0x5b   : > { %p2461_p5 = scmp.ne.s32.totalorder %s3065_s26, %s2460_s23  ;;  %p2467_p1 = scmp.lt.u32.totalorder %s2465_s24, %s2460_s23 }
  0x5c   : > { %p2469_p9 = scmp.lt.u32.totalorder %s2460_s23, %s3065_s26 }
  0x5d   : > { %p2463_p3 = pnand %p2461_p5, %p3026_p8  ;;  %p2468_p6 = por %p2467_p1, %p2466_p0 }
  0x5f   : > { %p2464_p10 = pneg %p2463_p3  ;;  %p2470_p11 = por %p2469_p9, %p2468_p6 }
  0x61   : > { %p2471_p13 = pnand %p2470_p11, %p2464_p10 }
  0x63   : > { %2474 = shalt.err (!%p2471_p13)
}
  0x64   : > { %s2475_s21 = scalar_lea.vmem %s3068_s2, 2048  ;;  %s2809_s16 = smov [#allocation8]  }
  0x65   : > { %p2476_p7 = scmp.ne.s32.totalorder %s3068_s2, %s2475_s21  ;;  %s2480_s11 = sshll.u32 %s2809_s16, 4  ;;  %s2481_s11 = int_to_ptr.vmem [resolvable:$false] %s2480_s11 }
  0x66   : > { %s2482_s8 = scalar_lea.vmem %s2481_s11, 4096  ;;  %p2483_p3 = scmp.lt.s32.totalorder %s3068_s2, %s2481_s11 }
  0x67   : > { %p2478_p12 = pnand %p2476_p7, %p3026_p8  ;;  %p2484_p2 = scmp.lt.s32.totalorder %s2482_s8, %s2475_s21 }
  0x69   : > { %p2479_p5 = pneg %p2478_p12  ;;  %p2485_p0 = por %p2484_p2, %p2483_p3 }
  0x6b   : > { %p2486_p1 = pnand %p2485_p0, %p2479_p5 }
  0x6d   : > { %2489 = shalt.err (!%p2486_p1)
}
  0x6e   : > { %s3679_s9 = smov 8   ;;  %s3680_s23 = smov 128  }
  0x6f   : > { %2313 = dma.hbm_to_vmem [thread:$0]  (!%p3002_p4), %s3065_s26, 2048, %s3068_s2, %s3072_s30, %s3680_s23, %s3680_s23, %s3679_s9  }
  0x70   : > { %s3103_s21 = scalar_lea.hbm %s3612_s1, %s2998_s18  ;;  %s428_s16 = scalar_lea.vmem [#allocation2], %s2995_s20 }
  0x71   : > { %s435_s11 = sshll.u32 %s428_s16, 4  ;;  %s425_s8 = scalar_lea.sflag [#allocation3], %s2992_s12  ;;  %s3106_s11 = int_to_ptr.vmem [resolvable:$true] %s435_s11 }
  0x72   : > { %s2490_s5 = scalar_lea.hbm %s3103_s21, 2048  ;;  %s2495_s4 = scalar_lea.hbm %s3612_s1, 4096 }
  0x73   : > { %p2491_p2 = scmp.ne.s32.totalorder %s3103_s21, %s2490_s5  ;;  %p2496_p9 = scmp.lt.u32.totalorder %s3103_s21, %s3612_s1 }
  0x74   : > { %p2497_p11 = scmp.lt.u32.totalorder %s2495_s4, %s2490_s5  ;;  %p2499_p7 = scmp.lt.u32.totalorder %s2490_s5, %s3103_s21 }
  0x75   : > { %p2493_p10 = pnand %p2491_p2, %p3026_p8 }
  0x76   : > { %p2498_p13 = por %p2497_p11, %p2496_p9 }
  0x77   : > { %p2494_p6 = pneg %p2493_p10 }
  0x78   : > { %p2500_p12 = por %p2499_p7, %p2498_p13 }
  0x7a   : > { %p2501_p5 = pnand %p2500_p12, %p2494_p6 }
  0x7c   : > { %2504 = shalt.err (!%p2501_p5)
}
  0x7d   : > { %s2505_s16 = scalar_lea.vmem %s3106_s11, 2048  ;;  %s2810_s2 = smov [#allocation2]  }
  0x7e   : > { %p2506_p3 = scmp.ne.s32.totalorder %s3106_s11, %s2505_s16  ;;  %s2510_s26 = sshll.u32 %s2810_s2, 4  ;;  %s2511_s26 = int_to_ptr.vmem [resolvable:$false] %s2510_s26 }
  0x7f   : > { %s2512_s13 = scalar_lea.vmem %s2511_s26, 4096  ;;  %p2513_p2 = scmp.lt.s32.totalorder %s3106_s11, %s2511_s26 }
  0x80   : > { %p2508_p0 = pnand %p2506_p3, %p3026_p8  ;;  %p2514_p10 = scmp.lt.s32.totalorder %s2512_s13, %s2505_s16 }
  0x82   : > { %p2509_p1 = pneg %p2508_p0  ;;  %p2515_p9 = por %p2514_p10, %p2513_p2 }
  0x84   : > { %p2516_p11 = pnand %p2515_p9, %p2509_p1 }
  0x86   : > { %2519 = shalt.err (!%p2516_p11)
}
  0x87   : > { %2304 = dma.hbm_to_vmem [thread:$0]  (!%p3002_p4), %s3103_s21, 2048, %s3106_s11, %s425_s8, %s3680_s23, %s3680_s23, %s3679_s9  }
  0x88   : > { %s3139_s24 = scalar_lea.hbm %s3614_s3, %s2998_s18  ;;  %s470_s16 = scalar_lea.vmem [#allocation7], %s2995_s20 }
  0x89   : > { %s477_s2 = sshll.u32 %s470_s16, 4  ;;  %s2520_s26 = scalar_lea.hbm %s3139_s24, 2048  ;;  %s3142_s2 = int_to_ptr.vmem [resolvable:$true] %s477_s2 }
  0x8a   : > { %p2521_p6 = scmp.ne.s32.totalorder %s3139_s24, %s2520_s26  ;;  %s2525_s11 = scalar_lea.hbm %s3614_s3, 4096 }
  0x8b   : > { %p2526_p12 = scmp.lt.u32.totalorder %s3139_s24, %s3614_s3  ;;  %p2527_p5 = scmp.lt.u32.totalorder %s2525_s11, %s2520_s26 }
  0x8c   : > { %p2523_p13 = pnand %p2521_p6, %p3026_p8  ;;  %p2529_p0 = scmp.lt.u32.totalorder %s2520_s26, %s3139_s24 }
  0x8d   : > { %p2528_p3 = por %p2527_p5, %p2526_p12 }
  0x8e   : > { %p2524_p7 = pneg %p2523_p13 }
  0x8f   : > { %p2530_p1 = por %p2529_p0, %p2528_p3 }
  0x91   : > { %p2531_p2 = pnand %p2530_p1, %p2524_p7 }
  0x93   : > { %2534 = shalt.err (!%p2531_p2)
}
  0x94   : > { %s2535_s4 = scalar_lea.vmem %s3142_s2, 2048  ;;  %s2811_s16 = smov [#allocation7]  }
  0x95   : > { %p2536_p10 = scmp.ne.s32.totalorder %s3142_s2, %s2535_s4  ;;  %s2540_s13 = sshll.u32 %s2811_s16, 4  ;;  %s2541_s13 = int_to_ptr.vmem [resolvable:$false] %s2540_s13 }
  0x96   : > { %s2542_s21 = scalar_lea.vmem %s2541_s13, 4096  ;;  %p2543_p6 = scmp.lt.s32.totalorder %s3142_s2, %s2541_s13 }
  0x97   : > { %p2538_p9 = pnand %p2536_p10, %p3026_p8  ;;  %p2544_p13 = scmp.lt.s32.totalorder %s2542_s21, %s2535_s4 }
  0x99   : > { %p2539_p11 = pneg %p2538_p9  ;;  %p2545_p12 = por %p2544_p13, %p2543_p6 }
  0x9b   : > { %p2546_p5 = pnand %p2545_p12, %p2539_p11 }
  0x9d   : > { %2549 = shalt.err (!%p2546_p5)
}
  0x9e   : > { %2310 = dma.hbm_to_vmem [thread:$0]  (!%p3002_p4), %s3139_s24, 2048, %s3142_s2, %s3020_s19, %s3680_s23, %s3680_s23, %s3679_s9  }
  0x9f   : > { %s3173_s8 = scalar_lea.hbm %s3617_s6, %s2998_s18  ;;  %s518_s5 = scalar_lea.vmem [#allocation10], %s2995_s20 }
  0xa0   : > { %s525_s4 = sshll.u32 %s518_s5, 4  ;;  %s2550_s16 = scalar_lea.hbm %s3173_s8, 2048  ;;  %s3176_s4 = int_to_ptr.vmem [resolvable:$true] %s525_s4 }
  0xa1   : > { %p2551_p7 = scmp.ne.s32.totalorder %s3173_s8, %s2550_s16  ;;  %s2555_s24 = scalar_lea.hbm %s3617_s6, 4096 }
  0xa2   : > { %p2556_p1 = scmp.lt.u32.totalorder %s3173_s8, %s3617_s6  ;;  %p2557_p2 = scmp.lt.u32.totalorder %s2555_s24, %s2550_s16 }
  0xa3   : > { %p2553_p3 = pnand %p2551_p7, %p3026_p8  ;;  %p2559_p9 = scmp.lt.u32.totalorder %s2550_s16, %s3173_s8 }
  0xa4   : > { %p2558_p10 = por %p2557_p2, %p2556_p1 }
  0xa5   : > { %p2554_p0 = pneg %p2553_p3 }
  0xa6   : > { %p2560_p11 = por %p2559_p9, %p2558_p10 }
  0xa8   : > { %p2561_p6 = pnand %p2560_p11, %p2554_p0 }
  0xaa   : > { %2564 = shalt.err (!%p2561_p6)
}
  0xab   : > { %s2565_s26 = scalar_lea.vmem %s3176_s4, 2048  ;;  %s2812_s11 = smov [#allocation10]  }
  0xac   : > { %p2566_p13 = scmp.ne.s32.totalorder %s3176_s4, %s2565_s26  ;;  %s2570_s5 = sshll.u32 %s2812_s11, 4  ;;  %s2571_s5 = int_to_ptr.vmem [resolvable:$false] %s2570_s5 }
  0xad   : > { %s2572_s13 = scalar_lea.vmem %s2571_s5, 4096  ;;  %p2573_p7 = scmp.lt.s32.totalorder %s3176_s4, %s2571_s5 }
  0xae   : > { %p2568_p12 = pnand %p2566_p13, %p3026_p8  ;;  %p2574_p3 = scmp.lt.s32.totalorder %s2572_s13, %s2565_s26 }
  0xb0   : > { %p2569_p5 = pneg %p2568_p12  ;;  %p2575_p1 = por %p2574_p3, %p2573_p7 }
  0xb2   : > { %p2576_p2 = pnand %p2575_p1, %p2569_p5 }
  0xb4   : > { %2579 = shalt.err (!%p2576_p2)
}
  0xb5   : > { %2316 = dma.hbm_to_vmem [thread:$0]  (!%p3002_p4), %s3173_s8, 2048, %s3176_s4, %s3072_s30, %s3680_s23, %s3680_s23, %s3679_s9  }
  0xb6   : > { %s3207_s24 = scalar_lea.hbm %s3618_s7, %s2998_s18  ;;  %s539_s2 = scalar_lea.vmem [#allocation11], %s2995_s20 }
  0xb7   : > { %s546_s21 = sshll.u32 %s539_s2, 4  ;;  %s536_s26 = scalar_lea.sflag [#allocation12], %s2992_s12  ;;  %s3210_s21 = int_to_ptr.vmem [resolvable:$true] %s546_s21 }
  0xb8   : > { %s2580_s11 = scalar_lea.hbm %s3207_s24, 2048  ;;  %s2585_s4 = scalar_lea.hbm %s3618_s7, 4096 }
  0xb9   : > { %p2581_p0 = scmp.ne.s32.totalorder %s3207_s24, %s2580_s11  ;;  %p2586_p11 = scmp.lt.u32.totalorder %s3207_s24, %s3618_s7 }
  0xba   : > { %p2587_p6 = scmp.lt.u32.totalorder %s2585_s4, %s2580_s11  ;;  %p2589_p12 = scmp.lt.u32.totalorder %s2580_s11, %s3207_s24 }
  0xbb   : > { %p2583_p10 = pnand %p2581_p0, %p3026_p8 }
  0xbc   : > { %p2588_p13 = por %p2587_p6, %p2586_p11 }
  0xbd   : > { %p2584_p9 = pneg %p2583_p10 }
  0xbe   : > { %p2590_p5 = por %p2589_p12, %p2588_p13 }
  0xc0   : > { %p2591_p7 = pnand %p2590_p5, %p2584_p9 }
  0xc2   : > { %2594 = shalt.err (!%p2591_p7)
}
  0xc3   : > { %s2595_s20 = scalar_lea.vmem %s3210_s21, 2048  ;;  %s2813_s13 = smov [#allocation11]  }
  0xc4   : > { %p2596_p3 = scmp.ne.s32.totalorder %s3210_s21, %s2595_s20  ;;  %s2600_s16 = sshll.u32 %s2813_s13, 4  ;;  %s2601_s16 = int_to_ptr.vmem [resolvable:$false] %s2600_s16 }
  0xc5   : > { %s2602_s19 = scalar_lea.vmem %s2601_s16, 4096  ;;  %p2603_p0 = scmp.lt.s32.totalorder %s3210_s21, %s2601_s16 }
  0xc6   : > { %p2598_p1 = pnand %p2596_p3, %p3026_p8  ;;  %p2604_p10 = scmp.lt.s32.totalorder %s2602_s19, %s2595_s20 }
  0xc8   : > { %p2599_p2 = pneg %p2598_p1  ;;  %p2605_p11 = por %p2604_p10, %p2603_p0 }
  0xca   : > { %p2606_p6 = pnand %p2605_p11, %p2599_p2 }
  0xcc   : > { %2609 = shalt.err (!%p2606_p6)
}
  0xcd   : > { %2319 = dma.hbm_to_vmem [thread:$0]  (!%p3002_p4), %s3207_s24, 2048, %s3210_s21, %s536_s26, %s3680_s23, %s3680_s23, %s3679_s9  }
  0xce   : > { %p3681_p8 = scmp.ne.s32.totalorder %s3676_s17, 0 }
  0xcf   : > { %s560_s29 = sand.u32 (!%p3681_p8), 1, %s2780_s25   ;;  %p3682_p9 = scmp.ne.s32.totalorder (!%p3681_p8), %s3663_s10, 0 }
  0xd0   : > { %558 = sbr.rel (%p3681_p8) target bundleno = 1626 (0x65a), region = 60  ;;  %s1790_s2 = sshll.u32 (!%p3681_p8), %s560_s29, 7 }
  0xd1   : > { %s561_s11 = scalar_lea.sflag (!%p3681_p8), [#allocation3], %s560_s29  ;;  %s3242_s30 = scalar_lea.vmem (!%p3681_p8), [#allocation2], %s1790_s2 }
  0xd7   : > { %2739 = dma.done.wait (%p3682_p9), %s561_s11, 2048  }
  0xd8   : > { %2741 = vsyncadd (%p3682_p9), %s561_s11, 4294965248  ;;  %s3249_s12 = sand.u32 1, %s2940_s14   ;;  %s3252_s17 = scalar_lea.vmem [#allocation5], %s1790_s2 }
  0xd9   : > { %s570_s15 = scalar_lea.sflag [#allocation6], %s3249_s12 }
  0xda   : > { %2743 = dma.done.wait (%p3682_p9), %s570_s15, 4096  }
  0xdb   : > { %2745 = vsyncadd (%p3682_p9), %s570_s15, 4294963200  ;;  %s3258_s9 = scalar_lea.vmem [#allocation7], %s1790_s2  ;;  %s588_s23 = scalar_lea.sflag [#allocation9], %s3249_s12 }
  0xdc   : > { %s3261_s24 = scalar_lea.vmem [#allocation8], %s1790_s2 }
  0xdd   : > { %2747 = dma.done.wait (%p3682_p9), %s588_s23, 4096  }
  0xde   : > { %2749 = vsyncadd (%p3682_p9), %s588_s23, 4294963200  ;;  %s3267_s14 = scalar_lea.vmem [#allocation10], %s1790_s2  ;;  %s606_s21 = scalar_lea.sflag [#allocation12], %s560_s29 }
  0xdf   : > { %s3269_s26 = scalar_lea.vmem [#allocation11], %s1790_s2 }
  0xe0   : > { %2751 = dma.done.wait (%p3682_p9), %s606_s21, 2048  }
  0xe1   : > { %2753 = vsyncadd (%p3682_p9), %s606_s21, 4294965248  ;;  %v2814_v0 = vmov 0.0|0.0   ;;  %vm2815_vm0 = vmmov 0   ;;  %v2816_v1 = vmov 0.0   ;;  %v710_v2 = vld [vmem:[%s3242_s30] sm:$0xff]  ;;  %v711_v3 = vld [vmem:[%s3242_s30 + $0x8] sm:$0xff] }
  0xe2   : > { %2139 = vmatprep.subr.bf16.mxu0 %v2814_v0  ;;  %2163 = vmatprep.subr.bf16.mxu1 %v2814_v0  ;;  %v810_v4 = vld [vmem:[%s3252_s17] sm:$0xff]  ;;  %v2140_v5 = vpack.c.bf16 %v711_v3, %v710_v2  ;;  %v811_v6 = vld [vmem:[%s3252_s17 + $0x8] sm:$0xff]  ;;  %v712_v7 = vld [vmem:[%s3242_s30 + $0x10] sm:$0xff]  ;;  %p696_p4 = scmp.lt.s32.totalorder %s2788_s27, 1  ;;  %p698_p13 = scmp.lt.s32.totalorder %s2792_s28, 1  ;;  %vm806_vm1 = vcmask 523264  }
  0xe3   : > { %1956 = vmatprep.mubr.msk.f32.mxu0 %vm2815_vm0, %v2816_v1  ;;  %1991 = vmatprep.mubr.msk.f32.mxu1 %vm2815_vm0, %v2816_v1  ;;  %v713_v8 = vld [vmem:[%s3242_s30 + $0x18] sm:$0xff]  ;;  %v2164_v9 = vpack.c.bf16 %v811_v6, %v810_v4  ;;  %v812_v10 = vld [vmem:[%s3252_s17 + $0x10] sm:$0xff]  ;;  %v714_v14 = vld [vmem:[%s3242_s30 + $0x20] sm:$0xff]  ;;  %s679_s19 = sand.u32 1, %s2768_s22   ;;  %s2817_s11 = smov 64   ;;  %vm1166_vm3 = vcmask 64512  }
  0xe4   : > { %v813_v11 = vld [vmem:[%s3252_s17 + $0x18] sm:$0xff]  ;;  %2141 = vmatpush3.bf16.msra.mxu0 %v2140_v5  ;;  %v2143_v12 = vpack.c.bf16 %v713_v8, %v712_v7  ;;  %v715_v15 = vld [vmem:[%s3242_s30 + $0x28] sm:$0xff]  ;;  %v814_v16 = vld [vmem:[%s3252_s17 + $0x20] sm:$0xff]  ;;  %s697_s10 = scalar_select %p696_p4, %s2788_s27, 1 }
  0xe5   : > { %2165 = vmatpush3.bf16.msra.mxu1 %v2164_v9  ;;  %2142 = vmatprep.subr.bf16.mxu0 %v2814_v0  ;;  %v2167_v13 = vpack.c.bf16 %v813_v11, %v812_v10  ;;  %v815_v17 = vld [vmem:[%s3252_s17 + $0x28] sm:$0xff]  ;;  %v2146_v18 = vpack.c.bf16 %v715_v15, %v714_v14  ;;  %v716_v20 = vld [vmem:[%s3242_s30 + $0x30] sm:$0xff]  ;;  %v717_v21 = vld [vmem:[%s3242_s30 + $0x38] sm:$0xff]  ;;  %s3317_s8 = scalar_select %p698_p13, %s2792_s28, 1 }
  0xe6   : > { %2166 = vmatprep.subr.bf16.mxu1 %v2814_v0  ;;  %v2170_v19 = vpack.c.bf16 %v815_v17, %v814_v16  ;;  %v816_v22 = vld [vmem:[%s3252_s17 + $0x30] sm:$0xff]  ;;  %v817_v23 = vld [vmem:[%s3252_s17 + $0x38] sm:$0xff]  ;;  %v2149_v24 = vpack.c.bf16 %v717_v21, %v716_v20  ;;  %v718_v26 = vld [vmem:[%s3242_s30 + $0x40] sm:$0xff]  ;;  %s1799_s4 = sshll.u32 %s697_s10, 1  ;;  %s3398_s29 = sshll.u32 %s679_s19, 3 }
  0xe7   : > { %v2173_v25 = vpack.c.bf16 %v817_v23, %v816_v22  ;;  %v719_v27 = vld [vmem:[%s3242_s30 + $0x48] sm:$0xff]  ;;  %v818_v28 = vld [vmem:[%s3252_s17 + $0x40] sm:$0xff]  ;;  %v720_v32 = vld [vmem:[%s3242_s30 + $0x50] sm:$0xff]  ;;  %s701_s18 = sadd.s32 %s1799_s4, %s3317_s8  ;;  %s688_s2 = scalar_lea.vmem [#allocation14], %s3398_s29 }
  0xe8   : > { %2144 = vmatpush3.bf16.msra.mxu0 %v2143_v12  ;;  %v819_v29 = vld [vmem:[%s3252_s17 + $0x48] sm:$0xff]  ;;  %v2152_v30 = vpack.c.bf16 %v719_v27, %v718_v26  ;;  %v721_v33 = vld [vmem:[%s3242_s30 + $0x58] sm:$0xff]  ;;  %v820_v34 = vld [vmem:[%s3252_s17 + $0x50] sm:$0xff]  ;;  %s1800_s5 = sshll.u32 %s701_s18, 3  ;;  %s695_s21 = scalar_lea.vmem [#allocation16], %s3398_s29 }
  0xe9   : > { %2168 = vmatpush3.bf16.msra.mxu1 %v2167_v13  ;;  %2145 = vmatprep.subr.bf16.mxu0 %v2814_v0  ;;  %v2176_v31 = vpack.c.bf16 %v819_v29, %v818_v28  ;;  %v821_v35 = vld [vmem:[%s3252_s17 + $0x58] sm:$0xff]  ;;  %v2155_v36 = vpack.c.bf16 %v721_v33, %v720_v32  ;;  %v722_v38 = vld [vmem:[%s3242_s30 + $0x60] sm:$0xff]  ;;  %v723_v39 = vld [vmem:[%s3242_s30 + $0x68] sm:$0xff]  ;;  %s703_s16 = scalar_lea.vmem %s3611_s0, %s1800_s5  ;;  %s3685_s18 = sld [smem:[#allocation36_spill]] }
  0xea   : > { %2169 = vmatprep.subr.bf16.mxu1 %v2814_v0  ;;  %v2179_v37 = vpack.c.bf16 %v821_v35, %v820_v34  ;;  %v822_v40 = vld [vmem:[%s3252_s17 + $0x60] sm:$0xff]  ;;  %v823_v41 = vld [vmem:[%s3252_s17 + $0x68] sm:$0xff]  ;;  %v2158_v42 = vpack.c.bf16 %v723_v39, %v722_v38  ;;  %v724_v44 = vld [vmem:[%s3242_s30 + $0x70] sm:$0xff] }
  0xeb   : > { %v2182_v43 = vpack.c.bf16 %v823_v41, %v822_v40  ;;  %v725_v45 = vld [vmem:[%s3242_s30 + $0x78] sm:$0xff]  ;;  %v824_v46 = vld [vmem:[%s3252_s17 + $0x70] sm:$0xff]  ;;  %v896_v50 = vld [vmem:[%s3258_s9] sm:$0xff]  ;;  %s3687_s30 = sld [smem:[#allocation41_spill]] }
  0xec   : > { %2147 = vmatpush3.bf16.msra.mxu0 %v2146_v18  ;;  %v825_v47 = vld [vmem:[%s3252_s17 + $0x78] sm:$0xff]  ;;  %v2161_v48 = vpack.c.bf16 %v725_v45, %v724_v44  ;;  %v897_v51 = vld [vmem:[%s3258_s9 + $0x8] sm:$0xff]  ;;  %v3339_v52 = vld [vmem:[%s703_s16] sm:$0xff]  ;;  %s3683_s17 = sld [smem:[#allocation39_spill]]  ;;  %s1468_s16 = sshll.u32 %s688_s2, 4  ;;  %s1469_s16 = int_to_ptr.vmem [resolvable:$true] %s1468_s16 }
  0xed   : > { %2171 = vmatpush3.bf16.msra.mxu1 %v2170_v19  ;;  %2148 = vmatprep.subr.bf16.mxu0 %v2814_v0  ;;  %v2185_v49 = vpack.c.bf16 %v825_v47, %v824_v46  ;;  %v2188_v53 = vpack.c.bf16 %v897_v51, %v896_v50  ;;  %v898_v54 = vld [vmem:[%s3258_s9 + $0x10] sm:$0xff]  ;;  %v899_v55 = vld [vmem:[%s3258_s9 + $0x18] sm:$0xff]  ;;  %v900_v57 = vld [vmem:[%s3258_s9 + $0x20] sm:$0xff]  ;;  %s2610_s23 = scalar_lea.vmem %s1469_s16, 128 }
  0xee   : > { %2172 = vmatprep.subr.bf16.mxu1 %v2814_v0  ;;  %v2191_v56 = vpack.c.bf16 %v899_v55, %v898_v54  ;;  %v901_v58 = vld [vmem:[%s3258_s9 + $0x28] sm:$0xff]  ;;  %v902_v60 = vld [vmem:[%s3258_s9 + $0x30] sm:$0xff]  ;;  %v903_v61 = vld [vmem:[%s3258_s9 + $0x38] sm:$0xff]  ;;  %p2611_p12 = scmp.ne.s32.totalorder %s1469_s16, %s2610_s23 }
  0xef   : > { %v2194_v59 = vpack.c.bf16 %v901_v58, %v900_v57  ;;  %v2197_v62 = vpack.c.bf16 %v903_v61, %v902_v60  ;;  %v904_v63 = vld [vmem:[%s3258_s9 + $0x40] sm:$0xff]  ;;  %v905_v2 = vld [vmem:[%s3258_s9 + $0x48] sm:$0xff]  ;;  %v906_v4 = vld [vmem:[%s3258_s9 + $0x50] sm:$0xff]  ;;  %s706_s5 = scalar_lea.vmem %s3685_s18, %s3317_s8  ;;  %s1806_s8 = sshll.u32 %s2788_s27, 1 }
  0xf0   : > { %2150 = vmatpush3.bf16.msra.mxu0 %v2149_v24  ;;  %v2200_v3 = vpack.c.bf16 %v905_v2, %v904_v63  ;;  %v907_v5 = vld [vmem:[%s3258_s9 + $0x58] sm:$0xff]  ;;  %v908_v7 = vld [vmem:[%s3258_s9 + $0x60] sm:$0xff]  ;;  %v909_v8 = vld [vmem:[%s3258_s9 + $0x68] sm:$0xff]  ;;  %s1449_s20 = sadd.s32 %s2792_s28, %s1806_s8 }
  0xf1   : > { %2174 = vmatpush3.bf16.msra.mxu1 %v2173_v25  ;;  %2151 = vmatprep.subr.bf16.mxu0 %v2814_v0  ;;  %v2203_v6 = vpack.c.bf16 %v907_v5, %v906_v4  ;;  %v2206_v9 = vpack.c.bf16 %v909_v8, %v908_v7  ;;  %v910_v10 = vld [vmem:[%s3258_s9 + $0x70] sm:$0xff]  ;;  %v911_v11 = vld [vmem:[%s3258_s9 + $0x78] sm:$0xff]  ;;  %v1002_v13 = vld [vmem:[%s3261_s24] sm:$0xff]  ;;  %s3483_s13 = sshll.u32 %s1449_s20, 7  ;;  %s3688_s15 = smov %s3687_s30 }
  0xf2   : > { %2175 = vmatprep.subr.bf16.mxu1 %v2814_v0  ;;  %v2209_v12 = vpack.c.bf16 %v911_v11, %v910_v10  ;;  %v1003_v14 = vld [vmem:[%s3261_s24 + $0x8] sm:$0xff]  ;;  %v1004_v15 = vld [vmem:[%s3261_s24 + $0x10] sm:$0xff]  ;;  %v1005_v17 = vld [vmem:[%s3261_s24 + $0x18] sm:$0xff]  ;;  %s1433_s9 = scalar_lea.sflag [#allocation15], %s3249_s12 }
  0xf3   : > { %v2212_v16 = vpack.c.bf16 %v1003_v14, %v1002_v13  ;;  %v2215_v18 = vpack.c.bf16 %v1005_v17, %v1004_v15  ;;  %v1006_v19 = vld [vmem:[%s3261_s24 + $0x20] sm:$0xff]  ;;  %v1007_v20 = vld [vmem:[%s3261_s24 + $0x28] sm:$0xff]  ;;  %v1008_v22 = vld [vmem:[%s3261_s24 + $0x30] sm:$0xff] }
  0xf4   : > { %2153 = vmatpush3.bf16.msra.mxu0 %v2152_v30  ;;  %v2218_v21 = vpack.c.bf16 %v1007_v20, %v1006_v19  ;;  %v1009_v23 = vld [vmem:[%s3261_s24 + $0x38] sm:$0xff]  ;;  %v1010_v25 = vld [vmem:[%s3261_s24 + $0x40] sm:$0xff]  ;;  %v1011_v26 = vld [vmem:[%s3261_s24 + $0x48] sm:$0xff] }
  0xf5   : > { %2177 = vmatpush3.bf16.msra.mxu1 %v2176_v31  ;;  %2154 = vmatprep.subr.bf16.mxu0 %v2814_v0  ;;  %v2221_v24 = vpack.c.bf16 %v1009_v23, %v1008_v22  ;;  %v2224_v27 = vpack.c.bf16 %v1011_v26, %v1010_v25  ;;  %v1012_v28 = vld [vmem:[%s3261_s24 + $0x50] sm:$0xff]  ;;  %v1013_v29 = vld [vmem:[%s3261_s24 + $0x58] sm:$0xff]  ;;  %v1014_v31 = vld [vmem:[%s3261_s24 + $0x60] sm:$0xff] }
  0xf6   : > { %2178 = vmatprep.subr.bf16.mxu1 %v2814_v0  ;;  %v2227_v30 = vpack.c.bf16 %v1013_v29, %v1012_v28  ;;  %v1015_v32 = vld [vmem:[%s3261_s24 + $0x68] sm:$0xff]  ;;  %v1016_v34 = vld [vmem:[%s3261_s24 + $0x70] sm:$0xff]  ;;  %v1017_v35 = vld [vmem:[%s3261_s24 + $0x78] sm:$0xff]  ;;  %s3684_s24 = sld [smem:[#allocation38_spill]] }
  0xf7   : > { %v2230_v33 = vpack.c.bf16 %v1015_v32, %v1014_v31  ;;  %v1801_v51 = vld [vmem:[%s706_s5] ss:$0 sm:$0xff]  ;;  %v1177_v63 = vld [vmem:[%s3267_s14 + $0x8] sm:$0xff]  ;;  %v1179_v7 = vld [vmem:[%s3267_s14 + $0x18] sm:$0xff] }
  0xf8   : > { %2156 = vmatpush3.bf16.msra.mxu0 %v2155_v36  ;;  %v2233_v36 = vpack.c.bf16 %v1017_v35, %v1016_v34  ;;  %v1181_v10 = vld [vmem:[%s3267_s14 + $0x28] sm:$0xff]  ;;  %v1183_v13 = vld [vmem:[%s3267_s14 + $0x38] sm:$0xff]  ;;  %v1184_v15 = vld [vmem:[%s3267_s14 + $0x40] sm:$0xff] }
  0xf9   : > { %2180 = vmatpush3.bf16.msra.mxu1 %v2179_v37  ;;  %2157 = vmatprep.subr.bf16.mxu0 %v2814_v0  ;;  %v1187_v19 = vld [vmem:[%s3267_s14 + $0x58] sm:$0xff]  ;;  %v1189_v22 = vld [vmem:[%s3267_s14 + $0x68] sm:$0xff] }
  0xfa   : > { %2181 = vmatprep.subr.bf16.mxu1 %v2814_v0  ;;  %v1191_v25 = vld [vmem:[%s3267_s14 + $0x78] sm:$0xff] }
  0xfc   : > { %2159 = vmatpush3.bf16.msra.mxu0 %v2158_v42  ;;  %v708_v44 = vld [vmem:[%s3684_s24] sm:$0xff]  ;;  %s2818_s24 = smov [#allocation14]  }
  0xfd   : > { %2183 = vmatpush3.bf16.msra.mxu1 %v2182_v43  ;;  %2160 = vmatprep.subr.bf16.mxu0 %v2814_v0  ;;  %v709_v43 = vld [vmem:[%s3683_s17] sm:$0xff]  ;;  %s3491_s17 = scalar_lea.hbm %s3687_s30, %s3483_s13  ;;  %s2614_s27 = sshll.u32 %s2818_s24, 4  ;;  %s2615_s27 = int_to_ptr.vmem [resolvable:$false] %s2614_s27 }
  0xfe   : > { %2184 = vmatprep.subr.bf16.mxu1 %v2814_v0  ;;  %s2616_s28 = scalar_lea.vmem %s2615_s27, 256  ;;  %p2617_p1 = scmp.lt.s32.totalorder %s1469_s16, %s2615_s27 }
  0xff   : > { %p2618_p2 = scmp.lt.s32.totalorder %s2616_s28, %s2610_s23 }
 0x100   : > { %2162 = vmatpush3.bf16.msra.mxu0 %v2161_v48 }
 0x101   : > { %2186 = vmatpush3.bf16.msra.mxu1 %v2185_v49  ;;  %2187 = vmatprep.subr.bf16.mxu0 %v2814_v0  ;;  %p2619_p0 = por %p2618_p2, %p2617_p1 }
 0x102   : > { %2211 = vmatprep.subr.bf16.mxu1 %v2814_v0 }
 0x103   : > { %1957 = vmatmul.mubr.f32.vlgmr.msra.gmra.mrb[0].mxu0 %v3339_v52 }
 0x104   : > { %1992 = vmatmul.mubr.f32.vlgmr.msra.gmra.mrb[0].mxu1 %v3339_v52  ;;  %2189 = vmatpush3.bf16.msra.mxu0 %v2188_v53 }
 0x105   : > { %2190 = vmatprep.subr.bf16.mxu0 %v2814_v0  ;;  %2026 = vmatprep.mubr.msk.f32.mxu0 %vm2815_vm0, %v2816_v1 }
 0x106   : > { %2061 = vmatprep.mubr.msk.f32.mxu1 %vm2815_vm0, %v2816_v1  ;;  %2213 = vmatpush3.bf16.msra.mxu1 %v2212_v16  ;;  %v1185_v16 = vld [vmem:[%s3267_s14 + $0x48] sm:$0xff] }
 0x107   : > { %2214 = vmatprep.subr.bf16.mxu1 %v2814_v0  ;;  %v2248_v17 = vpack.c.bf16 %v1185_v16, %v1184_v15 }
 0x108   : > { %2192 = vmatpush3.bf16.msra.mxu0 %v2191_v56 }
 0x109   : > { %2193 = vmatprep.subr.bf16.mxu0 %v2814_v0 }
 0x10a   : > { %2216 = vmatpush3.bf16.msra.mxu1 %v2215_v18  ;;  %v1186_v18 = vld [vmem:[%s3267_s14 + $0x50] sm:$0xff] }
 0x10b   : > { %2217 = vmatprep.subr.bf16.mxu1 %v2814_v0  ;;  %v2251_v20 = vpack.c.bf16 %v1187_v19, %v1186_v18 }
 0x10c   : > { %2195 = vmatpush3.bf16.msra.mxu0 %v2194_v59 }
 0x10d   : > { %2196 = vmatprep.subr.bf16.mxu0 %v2814_v0 }
 0x10e   : > { %2219 = vmatpush3.bf16.msra.mxu1 %v2218_v21  ;;  %v1188_v21 = vld [vmem:[%s3267_s14 + $0x60] sm:$0xff] }
 0x10f   : > { %2220 = vmatprep.subr.bf16.mxu1 %v2814_v0  ;;  %v2254_v23 = vpack.c.bf16 %v1189_v22, %v1188_v21 }
 0x110   : > { %2198 = vmatpush3.bf16.msra.mxu0 %v2197_v62  ;;  %v1176_v62 = vld [vmem:[%s3267_s14] sm:$0xff] }
 0x111   : > { %2199 = vmatprep.subr.bf16.mxu0 %v2814_v0  ;;  %v2236_v5 = vpack.c.bf16 %v1177_v63, %v1176_v62  ;;  %v1353_v62 = vld [vmem:[%s3269_s26 + $0x78] sm:$0xff] }
 0x112   : > { %2222 = vmatpush3.bf16.msra.mxu1 %v2221_v24  ;;  %v1190_v24 = vld [vmem:[%s3267_s14 + $0x70] sm:$0xff] }
 0x113   : > { %2223 = vmatprep.subr.bf16.mxu1 %v2814_v0  ;;  %v2257_v26 = vpack.c.bf16 %v1191_v25, %v1190_v24 }
 0x114   : > { %2201 = vmatpush3.bf16.msra.mxu0 %v2200_v3 }
 0x115   : > { %2202 = vmatprep.subr.bf16.mxu0 %v2814_v0 }
 0x116   : > { %2225 = vmatpush3.bf16.msra.mxu1 %v2224_v27  ;;  %v1160_v27 = vlaneseq }
 0x117   : > { %2226 = vmatprep.subr.bf16.mxu1 %v2814_v0 }
 0x118   : > { %2204 = vmatpush3.bf16.msra.mxu0 %v2203_v6  ;;  %v1178_v6 = vld [vmem:[%s3267_s14 + $0x10] sm:$0xff]  ;;  %v1161_v28 = vshrl.u32 %v1160_v27, 7  ;;  %v1163_v29 = vand.u32 127, %v1160_v27 }
 0x119   : > { %2205 = vmatprep.subr.bf16.mxu0 %v2814_v0  ;;  %v2239_v8 = vpack.c.bf16 %v1179_v7, %v1178_v6 }
 0x11a   : > { %2228 = vmatpush3.bf16.msra.mxu1 %v2227_v30  ;;  %vm1164_vm2 = vcmp.le.s32.totalorder %v1163_v29, %v1161_v28 }
 0x11b   : > { %2229 = vmatprep.subr.bf16.mxu1 %v2814_v0 }
 0x11c   : > { %2207 = vmatpush3.bf16.msra.mxu0 %v2206_v9  ;;  %v1180_v9 = vld [vmem:[%s3267_s14 + $0x20] sm:$0xff] }
 0x11d   : > { %2208 = vmatprep.subr.bf16.mxu0 %v2814_v0  ;;  %v2242_v11 = vpack.c.bf16 %v1181_v10, %v1180_v9 }
 0x11e   : > { %2231 = vmatpush3.bf16.msra.mxu1 %v2230_v33 }
 0x11f   : > { %2232 = vmatprep.subr.bf16.mxu1 %v2814_v0 }
 0x120   : > { %2210 = vmatpush3.bf16.msra.mxu0 %v2209_v12  ;;  %v1182_v12 = vld [vmem:[%s3267_s14 + $0x30] sm:$0xff]  ;;  %s3686_s14 = sld [smem:[#allocation31_spill]] }
 0x121   : > { %2099 = vmatprep.subr.mxu0 %v2816_v1  ;;  %v2245_v14 = vpack.c.bf16 %v1183_v13, %v1182_v12 }
 0x122   : > { %2234 = vmatpush3.bf16.msra.mxu1 %v2233_v36 }
 0x125   : > { %2062 = vmatmul.mubr.f32.vlgmr.msra.gmra.mrb[2].mxu1 %v3339_v52 }
 0x126   : > { %p3689_p5 = scmp.ne.s32.totalorder %s3686_s14, 0 }
 0x128   : > { %p2612_p7 = pnand %p2611_p12, %p3689_p5 }
 0x12a   : > { %p2613_p3 = pneg %p2612_p7 }
 0x12c   : > { %p2620_p10 = pnand %p2619_p0, %p2613_p3 }
 0x1d6   : > { %v792_v37 = vpop.f32.mrb[0].mxu0 }
 0x1d7   : > { %v3400_v38 = vpop.f32.mrb[0].mxu1  ;;  %v797_v39 = vsub.f32 0.0, %v792_v37  ;;  %v1958_v40 = vpop.f32.mrb[1].mxu0  ;;  %v796_v45 = vmul.f32 %v792_v37, %v709_v43 }
 0x1d8   : > { %v1993_v41 = vpop.f32.mrb[1].mxu1  ;;  %2027 = vmatmul.mubr.f32.vlgmr.msra.gmra.mrb[2].mxu0 %v3400_v38  ;;  %1425 = vst [vmem:[%s688_s2] sm:$0xff] %v3400_v38 }
 0x1d9   : > { %799 = vrot.lane.b32.xlu0 %v797_v39, %s2817_s11  ;;  %2101 = vmatprep.mubr.msk.f32.mxu0 %vm2815_vm0, %v2816_v1  ;;  %v1338_v41 = vld [vmem:[%s3269_s26] sm:$0xff] }
 0x1dd   : > { %803 = vrot.lane.b32.xlu0 %v792_v37, %s2817_s11 }
 0x1f8   : > { %v1084_v50 = vpop.f32.mrb[2].mxu1 }
 0x1f9   : > { %v2063_v52 = vpop.f32.mrb[3].mxu1  ;;  %v1088_v3 = vmul.f32 0.0625, %v1084_v50  ;;  %v1345_v50 = vld [vmem:[%s3269_s26 + $0x38] sm:$0xff] }
 0x1fa   : > { %v1346_v52 = vld [vmem:[%s3269_s26 + $0x40] sm:$0xff] }
 0x24b   : > { %v800_v42 = vpop.permute.xlu0 %799 }
 0x24f   : > { %v804_v46 = vpop.permute.xlu0 %803 }
 0x250   : > { %v807_v47 = vsel %vm806_vm1, %v800_v42, %v804_v46  ;;  %v1339_v42 = vld [vmem:[%s3269_s26 + $0x8] sm:$0xff] }
 0x251   : > { %v808_v48 = vmul.f32 %v807_v47, %v708_v44  ;;  %v1342_v47 = vld [vmem:[%s3269_s26 + $0x20] sm:$0xff] }
 0x253   : > { %v809_v49 = vadd.f32 %v808_v48, %v796_v45  ;;  %v1341_v45 = vld [vmem:[%s3269_s26 + $0x18] sm:$0xff]  ;;  %v1343_v48 = vld [vmem:[%s3269_s26 + $0x28] sm:$0xff] }
 0x255   : > { %1090 = vmatprep.subr.mxu1 %v809_v49  ;;  %1426 = vst [vmem:[%s695_s21] sm:$0xff] %v809_v49  ;;  %v2266_v49 = vpack.c.bf16 %v1343_v48, %v1342_v47 }
 0x256   : > { %1091 = vmatpush1.xpose.msra.mxu1 %v3400_v38 }
 0x257   : > { %2235 = vmatprep.subr.bf16.mxu1 %v2814_v0 }
 0x2ab   : > { %v985_v53 = vpop.f32.mrb[2].mxu0 }
 0x2ac   : > { %v986_v54 = vadd.f32 %v1801_v51, %v985_v53  ;;  %v2028_v55 = vpop.f32.mrb[3].mxu0  ;;  %v1347_v53 = vld [vmem:[%s3269_s26 + $0x48] sm:$0xff] }
 0x2ad   : > { %v1348_v55 = vld [vmem:[%s3269_s26 + $0x50] sm:$0xff] }
 0x2ae   : > { %v990_v56 = vsub.f32 0.0, %v986_v54  ;;  %v989_v60 = vmul.f32 %v986_v54, %v709_v43  ;;  %v1340_v43 = vld [vmem:[%s3269_s26 + $0x10] sm:$0xff] }
 0x2af   : > { %v2263_v46 = vpack.c.bf16 %v1341_v45, %v1340_v43 }
 0x2b0   : > { %992 = vrot.lane.b32.xlu1 %v990_v56, %s2817_s11  ;;  %v1349_v56 = vld [vmem:[%s3269_s26 + $0x58] sm:$0xff] }
 0x2b4   : > { %996 = vrot.lane.b32.xlu1 %v986_v54, %s2817_s11  ;;  %v2272_v54 = vpack.c.bf16 %v1347_v53, %v1346_v52 }
 0x322   : > { %v993_v57 = vpop.permute.xlu1 %992 }
 0x326   : > { %v997_v58 = vpop.permute.xlu1 %996 }
 0x327   : > { %v999_v59 = vsel %vm806_vm1, %v993_v57, %v997_v58  ;;  %v2275_v57 = vpack.c.bf16 %v1349_v56, %v1348_v55  ;;  %v1350_v58 = vld [vmem:[%s3269_s26 + $0x60] sm:$0xff] }
 0x328   : > { %v1000_v61 = vmul.f32 %v999_v59, %v708_v44  ;;  %v2260_v44 = vpack.c.bf16 %v1339_v42, %v1338_v41  ;;  %v1351_v59 = vld [vmem:[%s3269_s26 + $0x68] sm:$0xff] }
 0x32a   : > { %v1001_v2 = vadd.f32 %v1000_v61, %v989_v60  ;;  %v2278_v60 = vpack.c.bf16 %v1351_v59, %v1350_v58  ;;  %v1352_v61 = vld [vmem:[%s3269_s26 + $0x70] sm:$0xff] }
 0x32b   : > { %v2281_v63 = vpack.c.bf16 %v1353_v62, %v1352_v61 }
 0x32c   : > { %v1089_v4 = vmul.f32 0.0625, %v1001_v2 }
 0x32e   : > { %1154 = vmatprep.mubr.f32.mxu1 %v1089_v4 }
 0x32f   : > { %1155 = vmatmul.mubr.f32.vlgmr.msra.gmra.mrb[4].mxu1 %v1088_v3 }
 0x330   : > { %2237 = vmatpush3.bf16.msra.mxu1 %v2236_v5  ;;  %2096 = vmatprep.mubr.msk.f32.mxu1 %vm2815_vm0, %v2816_v1 }
 0x331   : > { %2238 = vmatprep.subr.bf16.mxu1 %v2814_v0 }
 0x334   : > { %2240 = vmatpush3.bf16.msra.mxu1 %v2239_v8 }
 0x335   : > { %2241 = vmatprep.subr.bf16.mxu1 %v2814_v0 }
 0x338   : > { %2243 = vmatpush3.bf16.msra.mxu1 %v2242_v11 }
 0x339   : > { %2244 = vmatprep.subr.bf16.mxu1 %v2814_v0 }
 0x33c   : > { %2246 = vmatpush3.bf16.msra.mxu1 %v2245_v14 }
 0x33d   : > { %2247 = vmatprep.subr.bf16.mxu1 %v2814_v0 }
 0x340   : > { %2249 = vmatpush3.bf16.msra.mxu1 %v2248_v17 }
 0x341   : > { %2250 = vmatprep.subr.bf16.mxu1 %v2814_v0 }
 0x344   : > { %2252 = vmatpush3.bf16.msra.mxu1 %v2251_v20 }
 0x345   : > { %2253 = vmatprep.subr.bf16.mxu1 %v2814_v0 }
 0x348   : > { %2255 = vmatpush3.bf16.msra.mxu1 %v2254_v23 }
 0x349   : > { %2256 = vmatprep.subr.bf16.mxu1 %v2814_v0 }
 0x34c   : > { %2258 = vmatpush3.bf16.msra.mxu1 %v2257_v26 }
 0x34f   : > { %2097 = vmatmul.mubr.f32.vlgmr.msra.gmra.mrb[6].mxu1 %v3400_v38 }
 0x402   : > { %v1156_v30 = vpop.f32.mrb[4].mxu1 }
 0x403   : > { %v1165_v31 = vsel %vm1164_vm2, %v1156_v30, -1e+30  ;;  %v1158_v32 = vpop.f32.mrb[5].mxu1 }
 0x404   : > { %v1167_v33 = vsel %vm1166_vm3, %v1165_v31, -inf }
 0x405   : > { %1168 = vmax.xlane.f32.xlu0 %v1167_v33 }
 0x422   : > { %v1258_v34 = vpop.f32.mrb[6].mxu1 }
 0x423   : > { %v2098_v35 = vpop.f32.mrb[7].mxu1  ;;  %2100 = vmatpush3.msra.mxu0 %v1258_v34 }
 0x424   : > { %2259 = vmatprep.subr.bf16.mxu0 %v2814_v0 }
 0x492   : > { %v1169_v36 = vpop.xlane.xlu0 %1168 }
 0x493   : > { %v1170_v37 = vsub.f32 %v1165_v31, %v1169_v36 }
 0x495   : > { %v1171_v38 = vmul.f32 1.442695, %v1170_v37 }
 0x497   : > { %2426 = vpow2.f32 %v1171_v38 }
 0x4a1   : > { %v2427_v39 = vpop.eup %2426 }
 0x4a2   : > { %2102 = vmatmul.mubr.msk.f32.vlgmr.msra.gmra.mrb[4].mxu0 %vm1166_vm3, %v2427_v39  ;;  %v1173_v40 = vsel %vm1166_vm3, %v2427_v39, 0.0 }
 0x4a3   : > { %1174 = vadd.xlane.f32.xlu1 %v1173_v40  ;;  %2136 = vmatprep.mubr.msk.f32.mxu0 %vm2815_vm0, %v2816_v1  ;;  %v1344_v1 = vld [vmem:[%s3269_s26 + $0x30] sm:$0xff] }
 0x4a4   : > { %2261 = vmatpush3.bf16.msra.mxu0 %v2260_v44  ;;  %v2269_v51 = vpack.c.bf16 %v1345_v50, %v1344_v1 }
 0x4a5   : > { %2262 = vmatprep.subr.bf16.mxu0 %v2814_v0 }
 0x4a8   : > { %2264 = vmatpush3.bf16.msra.mxu0 %v2263_v46 }
 0x4a9   : > { %2265 = vmatprep.subr.bf16.mxu0 %v2814_v0 }
 0x4ac   : > { %2267 = vmatpush3.bf16.msra.mxu0 %v2266_v49 }
 0x4ad   : > { %2268 = vmatprep.subr.bf16.mxu0 %v2814_v0 }
 0x4b0   : > { %2270 = vmatpush3.bf16.msra.mxu0 %v2269_v51 }
 0x4b1   : > { %2271 = vmatprep.subr.bf16.mxu0 %v2814_v0 }
 0x4b4   : > { %2273 = vmatpush3.bf16.msra.mxu0 %v2272_v54 }
 0x4b5   : > { %2274 = vmatprep.subr.bf16.mxu0 %v2814_v0 }
 0x4b8   : > { %2276 = vmatpush3.bf16.msra.mxu0 %v2275_v57 }
 0x4b9   : > { %2277 = vmatprep.subr.bf16.mxu0 %v2814_v0 }
 0x4bc   : > { %2279 = vmatpush3.bf16.msra.mxu0 %v2278_v60 }
 0x4bd   : > { %2280 = vmatprep.subr.bf16.mxu0 %v2814_v0 }
 0x4c0   : > { %2282 = vmatpush3.bf16.msra.mxu0 %v2281_v63 }
 0x530   : > { %v1175_v2 = vpop.xlane.xlu1 %1174 }
 0x531   : > { %2428 = vrcp.f32 %v1175_v2 }
 0x53b   : > { %v2429_v3 = vpop.eup %2428 }
 0x575   : > { %v1331_v4 = vpop.f32.mrb[4].mxu0 }
 0x576   : > { %v1337_v5 = vmul.f32 %v2429_v3, %v1331_v4  ;;  %v2103_v6 = vpop.f32.mrb[5].mxu0 }
 0x578   : > { %2137 = vmatmul.mubr.f32.vlgmr.msra.gmra.mrb[6].mxu0 %v1337_v5 }
 0x579   : > { %2623 = shalt.err (!%p2620_p10)
}
 0x57a   : > { %s2624_s2 = scalar_lea.hbm %s3491_s17, 128  ;;  %s2628_s18 = scalar_lea.hbm %s3688_s15, 512 }
 0x57b   : > { %p2625_p11 = scmp.ne.s32.totalorder %s3491_s17, %s2624_s2  ;;  %p2629_p9 = scmp.lt.u32.totalorder %s3491_s17, %s3688_s15 }
 0x57c   : > { %p2630_p4 = scmp.lt.u32.totalorder %s2628_s18, %s2624_s2  ;;  %p2632_p12 = scmp.lt.u32.totalorder %s2624_s2, %s3491_s17 }
 0x57d   : > { %p2626_p6 = pnand %p2625_p11, %p3689_p5 }
 0x57e   : > { %p2631_p13 = por %p2630_p4, %p2629_p9 }
 0x57f   : > { %p2627_p8 = pneg %p2626_p6 }
 0x580   : > { %p2633_p7 = por %p2632_p12, %p2631_p13 }
 0x582   : > { %p2634_p3 = pnand %p2633_p7, %p2627_p8 }
 0x584   : > { %2637 = shalt.err (!%p2634_p3)
}
 0x585   : > { %2296 = dma.vmem_to_hbm [thread:$0]  (%p3689_p5), %s1469_s16, 128, %s3491_s17, %s1433_s9  }
 0x586   : > { %s3690_s26 = sld [smem:[#allocation42_spill]]  ;;  %s1483_s23 = sshll.u32 %s695_s21, 4  ;;  %s1484_s23 = int_to_ptr.vmem [resolvable:$true] %s1483_s23 }
 0x587   : > { %s2638_s24 = scalar_lea.vmem %s1484_s23, 128  ;;  %s2819_s27 = smov [#allocation16]  }
 0x588   : > { %p2639_p1 = scmp.ne.s32.totalorder %s1484_s23, %s2638_s24  ;;  %s2642_s28 = sshll.u32 %s2819_s27, 4  ;;  %s2643_s28 = int_to_ptr.vmem [resolvable:$false] %s2642_s28 }
 0x589   : > { %s2644_s2 = scalar_lea.vmem %s2643_s28, 256  ;;  %p2645_p10 = scmp.lt.s32.totalorder %s1484_s23, %s2643_s28 }
 0x58a   : > { %p2640_p2 = pnand %p2639_p1, %p3689_p5  ;;  %p2646_p11 = scmp.lt.s32.totalorder %s2644_s2, %s2638_s24 }
 0x58c   : > { %s3691_s10 = smov %s3690_s26  ;;  %s3517_s30 = scalar_lea.hbm %s3690_s26, %s3483_s13 }
 0x58d   : > { %p2641_p0 = pneg %p2640_p2  ;;  %p2647_p6 = por %p2646_p11, %p2645_p10 }
 0x58f   : > { %p2648_p8 = pnand %p2647_p6, %p2641_p0 }
 0x591   : > { %2651 = shalt.err (!%p2648_p8)
}
 0x592   : > { %s2652_s21 = scalar_lea.hbm %s3517_s30, 128  ;;  %s2656_s4 = scalar_lea.hbm %s3691_s10, 512 }
 0x593   : > { %p2653_p9 = scmp.ne.s32.totalorder %s3517_s30, %s2652_s21  ;;  %p2657_p12 = scmp.lt.u32.totalorder %s3517_s30, %s3691_s10 }
 0x594   : > { %p2658_p7 = scmp.lt.u32.totalorder %s2656_s4, %s2652_s21  ;;  %p2660_p1 = scmp.lt.u32.totalorder %s2652_s21, %s3517_s30 }
 0x595   : > { %p2654_p4 = pnand %p2653_p9, %p3689_p5 }
 0x596   : > { %p2659_p3 = por %p2658_p7, %p2657_p12 }
 0x597   : > { %p2655_p13 = pneg %p2654_p4 }
 0x598   : > { %p2661_p2 = por %p2660_p1, %p2659_p3 }
 0x59a   : > { %p2662_p0 = pnand %p2661_p2, %p2655_p13 }
 0x59c   : > { %2665 = shalt.err (!%p2662_p0)
}
 0x59d   : > { %2297 = dma.vmem_to_hbm [thread:$0]  (%p3689_p5), %s1484_s23, 128, %s3517_s30, %s1433_s9  }
 0x59e   : > { %s681_s8 = scalar_lea.vmem [#allocation13], %s3398_s29  ;;  %s3692_s24 = sld [smem:[#allocation40_spill]] }
 0x59f   : > { %s1453_s20 = sshll.u32 %s681_s8, 4  ;;  %s1428_s12 = scalar_lea.sflag [#allocation4], %s679_s19  ;;  %s3541_s20 = int_to_ptr.vmem [resolvable:$true] %s1453_s20 }
 0x5a0   : > { %s2666_s28 = scalar_lea.vmem %s3541_s20, 128  ;;  %s2820_s29 = smov [#allocation13]  }
 0x5a1   : > { %p2667_p10 = scmp.ne.s32.totalorder %s3541_s20, %s2666_s28  ;;  %s2670_s9 = sshll.u32 %s2820_s29, 4  ;;  %s2671_s9 = int_to_ptr.vmem [resolvable:$false] %s2670_s9 }
 0x5a2   : > { %s2672_s30 = scalar_lea.vmem %s2671_s9, 256  ;;  %p2673_p8 = scmp.lt.s32.totalorder %s3541_s20, %s2671_s9 }
 0x5a3   : > { %p2668_p11 = pnand %p2667_p10, %p3689_p5  ;;  %p2674_p9 = scmp.lt.s32.totalorder %s2672_s30, %s2666_s28 }
 0x5a4   : > { %s3693_s2 = smov %s3692_s24  ;;  %s3547_s27 = scalar_lea.hbm %s3692_s24, %s3483_s13 }
 0x5a5   : > { %p2669_p6 = pneg %p2668_p11  ;;  %p2675_p4 = por %p2674_p9, %p2673_p8 }
 0x5a7   : > { %p2676_p13 = pnand %p2675_p4, %p2669_p6 }
 0x64b   : > { %v1420_v0 = vpop.f32.mrb[6].mxu0 }
 0x64c   : > { %1424 = vst [vmem:[%s681_s8] sm:$0xff] %v1420_v0  ;;  %v2138_v7 = vpop.f32.mrb[7].mxu0 }
 0x64d   : > { %2679 = shalt.err (!%p2676_p13)
}
 0x64e   : > { %s2680_s19 = scalar_lea.hbm %s3547_s27, 128  ;;  %s2684_s21 = scalar_lea.hbm %s3693_s2, 512 }
 0x64f   : > { %p2681_p12 = scmp.ne.s32.totalorder %s3547_s27, %s2680_s19  ;;  %p2685_p1 = scmp.lt.u32.totalorder %s3547_s27, %s3693_s2 }
 0x650   : > { %p2686_p2 = scmp.lt.u32.totalorder %s2684_s21, %s2680_s19  ;;  %p2688_p10 = scmp.lt.u32.totalorder %s2680_s19, %s3547_s27 }
 0x651   : > { %p2682_p7 = pnand %p2681_p12, %p3689_p5 }
 0x652   : > { %p2687_p0 = por %p2686_p2, %p2685_p1 }
 0x653   : > { %p2683_p3 = pneg %p2682_p7 }
 0x654   : > { %p2689_p11 = por %p2688_p10, %p2687_p0 }
 0x656   : > { %p2690_p6 = pnand %p2689_p11, %p2683_p3 }
 0x658   : > { %2693 = shalt.err (!%p2690_p6)
}
 0x659   : > { %2295 = dma.vmem_to_hbm [thread:$0]  (%p3689_p5), %s3541_s20, 128, %s3547_s27, %s1428_s12  }
 0x65a PF: > { %s3694_s4 = sld [smem:[#allocation28_spill]]  ;;  %s3695_s18 = sld [smem:[#allocation23_spill]] }
 0x65b   : > { %s3696_s5 = sld [smem:[#allocation34_spill]] }
 0x660   : > { %p2331_p8 = scmp.ge.s32.totalorder %s3694_s4, 2  ;;  %s1495_s8 = sand.u32 1, %s3695_s18  }
 0x661   : > { %p3697_p9 = scmp.ne.s32.totalorder %s3696_s5, 0  ;;  %s1496_s11 = scalar_lea.sflag [#allocation4], %s1495_s8 }
 0x663   : > { %p2321_p4 = pnand %p2331_p8, %p3697_p9 }
 0x665   : > { %2755 = dma.done.wait (!%p2321_p4), %s1496_s11, 128  }
 0x666   : > { %2757 = vsyncadd (!%p2321_p4), %s1496_s11, 4294967168  ;;  %s3698_s26 = sadd.s32 4294967294, %s3694_s4  }
 0x667   : > { %s1504_s24 = sand.u32 1, %s3698_s26  }
 0x668   : > { %s1505_s28 = scalar_lea.sflag [#allocation15], %s1504_s24 }
 0x669   : > { %2759 = dma.done.wait (!%p2321_p4), %s1505_s28, 256  }
 0x66a   : > { %2761 = vsyncadd (!%p2321_p4), %s1505_s28, 4294967040  ;;  %s41_s13 = sadd.s32 1, %s3694_s4   ;;  %s3699_s14 = sld [smem:[#allocation24_spill]] }
 0x66b   : > { %p38_p5 = scmp.ge.s32.totalorder %s41_s13, 6   ;;  %s3700_s23 = sld [smem:[#allocation33_spill]] }
 0x66c   : > { %s3701_s20 = sld [smem:[#allocation25_spill]]  ;;  %s3702_s26 = sld [smem:[#allocation32_spill]] }
 0x66d   : > { %s3703_s27 = sld [smem:[#allocation26_spill]]  ;;  %s3704_s28 = sld [smem:[#allocation27_spill]] }
 0x66e   : > { %s3705_s29 = sld [smem:[#allocation29_spill]]  ;;  %s3706_s30 = sld [smem:[#allocation30_spill]] }
 0x66f   : > { %s3707_s21 = smov %s2768_s22  ;;  %s3709_s24 = smov %s2780_s25 }
 0x670   : > { %s3708_s22 = smov %s3699_s14  ;;  %40 = sbr.rel (!%p38_p5) target bundleno = 26 (0x1a), region = 204 }
 0x672   : > { %s3710_s25 = smov %s3701_s20 }
 0x677   :  { %1519 = vsyncpa [#allocation3], 1 }
 0x678   :  { %1521 = vsyncpa [#allocation3 + $0x1], 1 }
 0x679   :  { %1522 = vsyncpa [#allocation6], 1 }
 0x67a   :  { %1524 = vsyncpa [#allocation6 + $0x1], 1 }
 0x67b   :  { %1525 = vsyncpa [#allocation9], 1 }
 0x67c   :  { %1527 = vsyncpa [#allocation9 + $0x1], 1 }
 0x67d   :  { %1528 = vsyncpa [#allocation12], 1 }
 0x67e   :  { %1530 = vsyncpa [#allocation12 + $0x1], 1 }
 0x67f   :  { %1531 = vsyncpa [#allocation4], 1 }
 0x680   :  { %1533 = vsyncpa [#allocation4 + $0x1], 1 }
 0x681   :  { %1534 = vsyncpa [#allocation15], 1 }
 0x682   :  { %1536 = vsyncpa [#allocation15 + $0x1], 1 }

</bundles_post_ra>
